<compile_context>
chip_gen: v7x
topology: tpu7x:2x2x1
jax: 0.10.0
libtpu: 0.0.40
codegen_flags: <defaults>
</compile_context>

<pallas_src>
import functools

import jax
import jax.numpy as jnp
from jax.experimental import pallas as pl
from jax.experimental.pallas import tpu as pltpu


def _adaptive_bounds(in_size, out_size):
    """PyTorch adaptive pooling window boundaries (static per output index)."""
    starts = [(i * in_size) // out_size for i in range(out_size)]
    ends = [-(-((i + 1) * in_size) // out_size) for i in range(out_size)]  # ceil
    return tuple(zip(starts, ends))


def _round_up(n, m):
    return -(-n // m) * m


def _divisors_desc(n):
    ds = set()
    i = 1
    while i * i <= n:
        if n % i == 0:
            ds.add(i)
            ds.add(n // i)
        i += 1
    return sorted(ds, reverse=True)


def _largest_divisor_leq(n, cap):
    cap = max(1, cap)
    for d in _divisors_desc(n):
        if d <= cap:
            return d
    return 1


def _padded_plane_bytes(H, W, itemsize):
    """VMEM footprint of one (H, W) plane: H on sublanes, W on lanes (with padding)."""
    sub = max(1, 32 // itemsize)          # sublane packing: f32 -> 8, bf16 -> 16, int8 -> 32
    return _round_up(H, sub) * _round_up(W, 128) * itemsize


def _vmem_capacity_bytes():
    """Generation-aware VMEM size; conservative (v7x = 64 MiB) if the query fails."""
    try:
        info = pltpu.get_tpu_info()
        cap = int(getattr(info, "vmem_capacity_bytes", 0) or 0)
        if cap > 0:
            return cap
    except Exception:
        pass
    return 64 * 1024 * 1024


def _choose_tiles(B, C, H, W, itemsize, vmem_cap):
    """Pick (TB, TC) so 2x x-block + 2x int8 mask-block + 2x out-block sit well under
    physical VMEM, per-step blocks are multi-MiB when the problem allows (amortize the
    ~0.35 us/step pipeline overhead), and — when splittable — the grid has >= 2
    'parallel' steps so both v7x TensorCores are used."""
    budget = max(1, vmem_cap // 8)        # per x pipeline buffer
    plane = _padded_plane_bytes(H, W, itemsize)

    TC = 1
    for d in _divisors_desc(C):           # largest channel-tile divisor under budget
        if d * plane <= budget:
            TC = d
            break
    TB = 1
    for d in _divisors_desc(B):           # then grow the batch tile under the same budget
        if d * TC * plane <= budget:
            TB = d
            break

    if (B // TB) * (C // TC) < 2:         # keep both v7x TensorCores busy when possible
        if B > 1:
            TB = _largest_divisor_leq(B, B // 2)
        elif C > 1:
            TC = _largest_divisor_leq(C, C // 2)
    return TB, TC


def _masked_adaptive_max_pool_kernel(x_ref, m_ref, o_ref, *, h_bounds, w_bounds):
    # x_ref: (TB, TC, H, W)    float, W on lanes / H on sublanes
    # m_ref: (TBm, TCm, H, W)  int8; TBm/TCm may be 1 (broadcast masks never materialized)
    # o_ref: (TB, TC, out_h, out_w)
    neg = jnp.asarray(-10000.0, dtype=x_ref.dtype)
    for i, (hs, he) in enumerate(h_bounds):
        # Masked H-band reduction: the where() is applied per band, so the full masked
        # tile is never live in VMEM.
        xb = x_ref[:, :, hs:he, :]
        mb = m_ref[:, :, hs:he, :] != 0                      # broadcasts over TB/TC if needed
        band = jnp.max(jnp.where(mb, xb, neg), axis=2, keepdims=True)   # (TB, TC, 1, W)
        for j, (ws, we) in enumerate(w_bounds):
            # Short lane-slice maxima per output column; static-slice stores into the
            # (tiny) output tile.
            o_ref[:, :, i:i + 1, j:j + 1] = jnp.max(
                band[:, :, :, ws:we], axis=3, keepdims=True).astype(o_ref.dtype)


def masked_adaptive_max_pool2d(x, mask, output_size):
    """x: (B, C, H, W); mask: bool/{0,1}, broadcastable to x (NCHW).

    Returns (B, C, out_h, out_w), matching MaskedAdaptiveMaxPool2d(output_size).
    Note: assumes the module's boolean-mask contract (where(mask, x, -10000));
    the `x * mask` scaling of a non-binary float mask is not reproduced.
    """
    if isinstance(output_size, int):
        out_h = out_w = int(output_size)
    else:
        out_h, out_w = (int(s) for s in output_size)

    B, C, H, W = x.shape

    # --- mask normalization: keep size-1 broadcast dims, never materialize to x's shape.
    mask = jnp.asarray(mask)
    if mask.ndim < 4:
        mask = mask.reshape((1,) * (4 - mask.ndim) + mask.shape)
    if mask.shape[2] != H or mask.shape[3] != W:
        mask = jnp.broadcast_to(mask, mask.shape[:2] + (H, W))
    Bm, Cm = mask.shape[0], mask.shape[1]
    if Bm not in (1, B):
        mask = jnp.broadcast_to(mask, (B,) + mask.shape[1:])
        Bm = B
    if Cm not in (1, C):
        mask = jnp.broadcast_to(mask, (Bm, C, H, W))
        Cm = C
    # int8 mask in HBM (1 B/elem).  int8/uint8 callers pay nothing; bool masks pay one
    # cheap byte-wise pass (bool VMEM refs are not relied upon, for lowering robustness).
    if mask.dtype != jnp.int8 and mask.dtype != jnp.uint8:
        mask = (mask != 0).astype(jnp.int8)

    itemsize = jnp.dtype(x.dtype).itemsize
    vmem_cap = _vmem_capacity_bytes()
    TB, TC = _choose_tiles(B, C, H, W, itemsize, vmem_cap)
    TBm = TB if Bm == B else 1
    TCm = TC if Cm == C else 1

    if Bm == B and Cm == C:
        m_map = lambda b, c: (b, c, 0, 0)
    elif Bm == B:
        m_map = lambda b, c: (b, 0, 0, 0)
    elif Cm == C:
        m_map = lambda b, c: (0, c, 0, 0)
    else:
        m_map = lambda b, c: (0, 0, 0, 0)

    kernel = functools.partial(
        _masked_adaptive_max_pool_kernel,
        h_bounds=_adaptive_bounds(H, out_h),
        w_bounds=_adaptive_bounds(W, out_w),
    )

    # ~3/4 of physical VMEM: 96 MiB on 128-MiB chips (v5e/v6e), 48 MiB on v7x's 64 MiB.
    vmem_limit = int(max(32 * 1024 * 1024, min((vmem_cap * 3) // 4, 96 * 1024 * 1024)))

    return pl.pallas_call(
        kernel,
        out_shape=jax.ShapeDtypeStruct((B, C, out_h, out_w), x.dtype),
        grid=(B // TB, C // TC),
        in_specs=[
            pl.BlockSpec((TB, TC, H, W), lambda b, c: (b, c, 0, 0)),
            pl.BlockSpec((TBm, TCm, H, W), m_map),
        ],
        out_specs=pl.BlockSpec((TB, TC, out_h, out_w), lambda b, c: (b, c, 0, 0)),
        compiler_params=pltpu.CompilerParams(
            dimension_semantics=("parallel", "parallel"),
            vmem_limit_bytes=vmem_limit,
        ),
    )(x, mask)


def _reference(x, mask, output_size):
    """Pure-JAX reference (same adaptive-window math as PyTorch)."""
    if isinstance(output_size, int):
        out_h = out_w = output_size
    else:
        out_h, out_w = output_size
    B, C, H, W = x.shape
    m = jnp.broadcast_to(jnp.asarray(mask) != 0, x.shape)
    xm = jnp.where(m, x, jnp.asarray(-10000.0, x.dtype))
    hb = _adaptive_bounds(H, out_h)
    wb = _adaptive_bounds(W, out_w)
    rows = []
    for (hs, he) in hb:
        cols = [jnp.max(xm[:, :, hs:he, ws:we], axis=(2, 3)) for (ws, we) in wb]
        rows.append(jnp.stack(cols, axis=-1))
    return jnp.stack(rows, axis=-2)


if __name__ == "__main__":
    key = jax.random.PRNGKey(0)
    kx, km1, km2, km3 = jax.random.split(key, 4)

    B, C, H, W = 2, 4, 16, 16
    x = jax.random.normal(kx, (B, C, H, W), dtype=jnp.float32)

    # Case 1: uniform windows (16 -> 4), full (B, C, H, W) boolean mask.
    mask_full = jax.random.uniform(km1, (B, C, H, W)) > 0.5
    out1 = jax.block_until_ready(masked_adaptive_max_pool2d(x, mask_full, 4))
    assert out1.shape == (B, C, 4, 4)
    assert jnp.allclose(out1, _reference(x, mask_full, 4), atol=1e-6), \
        "mismatch vs reference (uniform windows)"

    # Case 2: ragged adaptive windows (16 -> 3), channel-broadcast (B, 1, H, W) mask.
    mask_bcast = jax.random.uniform(km2, (B, 1, H, W)) > 0.5
    out2 = jax.block_until_ready(masked_adaptive_max_pool2d(x, mask_bcast, 3))
    assert out2.shape == (B, C, 3, 3)
    assert jnp.allclose(out2, _reference(x, mask_bcast, 3), atol=1e-6), \
        "mismatch vs reference (ragged windows)"

    # Case 3: batch+channel-broadcast (1, 1, H, W) int8 mask (ships with zero conversion).
    mask_11 = (jax.random.uniform(km3, (1, 1, H, W)) > 0.5).astype(jnp.int8)
    out3 = jax.block_until_ready(masked_adaptive_max_pool2d(x, mask_11, 4))
    assert out3.shape == (B, C, 4, 4)
    assert jnp.allclose(out3, _reference(x, mask_11, 4), atol=1e-6), \
        "mismatch vs reference (fully broadcast mask)"

    print("KERNEL_OK")
</pallas_src>

<mosaic_0001>
module attributes {stable_mosaic.version = 11 : i64} {
  func.func @_masked_adaptive_max_pool_kernel(%arg0: i32, %arg1: i32, %arg2: memref<1x4x16x16xf32, #tpu.memory_space<vmem>>, %arg3: memref<1x4x16x16xi8, #tpu.memory_space<vmem>>, %arg4: memref<1x4x4x4xf32, #tpu.memory_space<vmem>>) attributes {dimension_semantics = [#tpu.dimension_semantics<parallel>, #tpu.dimension_semantics<parallel>], iteration_bounds = array<i64: 2, 1>, scalar_prefetch = 0 : i64, scratch_operands = 0 : i64, tpu.core_type = #tpu.core_type<tc>, window_params = [{transform_indices = @transform_0, window_bounds = array<i64: 1, 4, 16, 16>}, {transform_indices = @transform_1, window_bounds = array<i64: 1, 4, 16, 16>}, {transform_indices = @transform_2, window_bounds = array<i64: 1, 4, 4, 4>}]} {
    %c0 = arith.constant 0 : index
    %c0_0 = arith.constant 0 : index
    %c0_1 = arith.constant 0 : index
    %c0_2 = arith.constant 0 : index
    %0 = vector.load %arg2[%c0, %c0_0, %c0_1, %c0_2] : memref<1x4x16x16xf32, #tpu.memory_space<vmem>>, vector<1x4x4x16xf32>
    %c0_3 = arith.constant 0 : index
    %c0_4 = arith.constant 0 : index
    %c0_5 = arith.constant 0 : index
    %c0_6 = arith.constant 0 : index
    %1 = vector.load %arg3[%c0_3, %c0_4, %c0_5, %c0_6] : memref<1x4x16x16xi8, #tpu.memory_space<vmem>>, vector<1x4x4x16xi8>
    %c0_i8 = arith.constant 0 : i8
    %2 = vector.broadcast %c0_i8 : i8 to vector<1x4x4x16xi8>
    %3 = arith.cmpi ne, %1, %2 : vector<1x4x4x16xi8>
    %cst = arith.constant -1.000000e+04 : f32
    %4 = vector.broadcast %cst : f32 to vector<1x4x4x16xf32>
    %5 = arith.select %3, %0, %4 : vector<1x4x4x16xi1>, vector<1x4x4x16xf32>
    %cst_7 = arith.constant dense<0xFF800000> : vector<1x4x16xf32>
    %6 = vector.multi_reduction <maximumf>, %5, %cst_7 [2] : vector<1x4x4x16xf32> to vector<1x4x16xf32>
    %7 = vector.shape_cast %6 : vector<1x4x16xf32> to vector<1x4x1x16xf32>
    %8 = vector.extract_strided_slice %7 {offsets = [0, 0, 0, 0], sizes = [1, 4, 1, 4], strides = [1, 1, 1, 1]} : vector<1x4x1x16xf32> to vector<1x4x1x4xf32>
    %cst_8 = arith.constant dense<0xFF800000> : vector<1x4x1xf32>
    %9 = vector.multi_reduction <maximumf>, %8, %cst_8 [3] : vector<1x4x1x4xf32> to vector<1x4x1xf32>
    %10 = vector.shape_cast %9 : vector<1x4x1xf32> to vector<1x4x1x1xf32>
    %c0_9 = arith.constant 0 : index
    %c0_10 = arith.constant 0 : index
    %c0_11 = arith.constant 0 : index
    %c0_12 = arith.constant 0 : index
    %11 = vector.load %arg4[%c0_9, %c0_10, %c0_11, %c0_12] : memref<1x4x4x4xf32, #tpu.memory_space<vmem>>, vector<1x4x1x1xf32>
    tpu.vector_store %arg4[%c0_9, %c0_10, %c0_11, %c0_12], %10 {strides = array<i32>} : memref<1x4x4x4xf32, #tpu.memory_space<vmem>>, vector<1x4x1x1xf32>,
    %12 = vector.extract_strided_slice %7 {offsets = [0, 0, 0, 4], sizes = [1, 4, 1, 4], strides = [1, 1, 1, 1]} : vector<1x4x1x16xf32> to vector<1x4x1x4xf32>
    %cst_13 = arith.constant dense<0xFF800000> : vector<1x4x1xf32>
    %13 = vector.multi_reduction <maximumf>, %12, %cst_13 [3] : vector<1x4x1x4xf32> to vector<1x4x1xf32>
    %14 = vector.shape_cast %13 : vector<1x4x1xf32> to vector<1x4x1x1xf32>
    %c0_14 = arith.constant 0 : index
    %c0_15 = arith.constant 0 : index
    %c0_16 = arith.constant 0 : index
    %c1 = arith.constant 1 : index
    %15 = vector.load %arg4[%c0_14, %c0_15, %c0_16, %c1] : memref<1x4x4x4xf32, #tpu.memory_space<vmem>>, vector<1x4x1x1xf32>
    tpu.vector_store %arg4[%c0_14, %c0_15, %c0_16, %c1], %14 {strides = array<i32>} : memref<1x4x4x4xf32, #tpu.memory_space<vmem>>, vector<1x4x1x1xf32>,
    %16 = vector.extract_strided_slice %7 {offsets = [0, 0, 0, 8], sizes = [1, 4, 1, 4], strides = [1, 1, 1, 1]} : vector<1x4x1x16xf32> to vector<1x4x1x4xf32>
    %cst_17 = arith.constant dense<0xFF800000> : vector<1x4x1xf32>
    %17 = vector.multi_reduction <maximumf>, %16, %cst_17 [3] : vector<1x4x1x4xf32> to vector<1x4x1xf32>
    %18 = vector.shape_cast %17 : vector<1x4x1xf32> to vector<1x4x1x1xf32>
    %c0_18 = arith.constant 0 : index
    %c0_19 = arith.constant 0 : index
    %c0_20 = arith.constant 0 : index
    %c2 = arith.constant 2 : index
    %19 = vector.load %arg4[%c0_18, %c0_19, %c0_20, %c2] : memref<1x4x4x4xf32, #tpu.memory_space<vmem>>, vector<1x4x1x1xf32>
    tpu.vector_store %arg4[%c0_18, %c0_19, %c0_20, %c2], %18 {strides = array<i32>} : memref<1x4x4x4xf32, #tpu.memory_space<vmem>>, vector<1x4x1x1xf32>,
    %20 = vector.extract_strided_slice %7 {offsets = [0, 0, 0, 12], sizes = [1, 4, 1, 4], strides = [1, 1, 1, 1]} : vector<1x4x1x16xf32> to vector<1x4x1x4xf32>
    %cst_21 = arith.constant dense<0xFF800000> : vector<1x4x1xf32>
    %21 = vector.multi_reduction <maximumf>, %20, %cst_21 [3] : vector<1x4x1x4xf32> to vector<1x4x1xf32>
    %22 = vector.shape_cast %21 : vector<1x4x1xf32> to vector<1x4x1x1xf32>
    %c0_22 = arith.constant 0 : index
    %c0_23 = arith.constant 0 : index
    %c0_24 = arith.constant 0 : index
    %c3 = arith.constant 3 : index
    %23 = vector.load %arg4[%c0_22, %c0_23, %c0_24, %c3] : memref<1x4x4x4xf32, #tpu.memory_space<vmem>>, vector<1x4x1x1xf32>
    tpu.vector_store %arg4[%c0_22, %c0_23, %c0_24, %c3], %22 {strides = array<i32>} : memref<1x4x4x4xf32, #tpu.memory_space<vmem>>, vector<1x4x1x1xf32>,
    %c0_25 = arith.constant 0 : index
    %c0_26 = arith.constant 0 : index
    %c4 = arith.constant 4 : index
    %c0_27 = arith.constant 0 : index
    %24 = vector.load %arg2[%c0_25, %c0_26, %c4, %c0_27] : memref<1x4x16x16xf32, #tpu.memory_space<vmem>>, vector<1x4x4x16xf32>
    %c0_28 = arith.constant 0 : index
    %c0_29 = arith.constant 0 : index
    %c4_30 = arith.constant 4 : index
    %c0_31 = arith.constant 0 : index
    %25 = vector.load %arg3[%c0_28, %c0_29, %c4_30, %c0_31] : memref<1x4x16x16xi8, #tpu.memory_space<vmem>>, vector<1x4x4x16xi8>
    %c0_i8_32 = arith.constant 0 : i8
    %26 = vector.broadcast %c0_i8_32 : i8 to vector<1x4x4x16xi8>
    %27 = arith.cmpi ne, %25, %26 : vector<1x4x4x16xi8>
    %cst_33 = arith.constant -1.000000e+04 : f32
    %28 = vector.broadcast %cst_33 : f32 to vector<1x4x4x16xf32>
    %29 = arith.select %27, %24, %28 : vector<1x4x4x16xi1>, vector<1x4x4x16xf32>
    %cst_34 = arith.constant dense<0xFF800000> : vector<1x4x16xf32>
    %30 = vector.multi_reduction <maximumf>, %29, %cst_34 [2] : vector<1x4x4x16xf32> to vector<1x4x16xf32>
    %31 = vector.shape_cast %30 : vector<1x4x16xf32> to vector<1x4x1x16xf32>
    %32 = vector.extract_strided_slice %31 {offsets = [0, 0, 0, 0], sizes = [1, 4, 1, 4], strides = [1, 1, 1, 1]} : vector<1x4x1x16xf32> to vector<1x4x1x4xf32>
    %cst_35 = arith.constant dense<0xFF800000> : vector<1x4x1xf32>
    %33 = vector.multi_reduction <maximumf>, %32, %cst_35 [3] : vector<1x4x1x4xf32> to vector<1x4x1xf32>
    %34 = vector.shape_cast %33 : vector<1x4x1xf32> to vector<1x4x1x1xf32>
    %c0_36 = arith.constant 0 : index
    %c0_37 = arith.constant 0 : index
    %c1_38 = arith.constant 1 : index
    %c0_39 = arith.constant 0 : index
    %35 = vector.load %arg4[%c0_36, %c0_37, %c1_38, %c0_39] : memref<1x4x4x4xf32, #tpu.memory_space<vmem>>, vector<1x4x1x1xf32>
    tpu.vector_store %arg4[%c0_36, %c0_37, %c1_38, %c0_39], %34 {strides = array<i32>} : memref<1x4x4x4xf32, #tpu.memory_space<vmem>>, vector<1x4x1x1xf32>,
    %36 = vector.extract_strided_slice %31 {offsets = [0, 0, 0, 4], sizes = [1, 4, 1, 4], strides = [1, 1, 1, 1]} : vector<1x4x1x16xf32> to vector<1x4x1x4xf32>
    %cst_40 = arith.constant dense<0xFF800000> : vector<1x4x1xf32>
    %37 = vector.multi_reduction <maximumf>, %36, %cst_40 [3] : vector<1x4x1x4xf32> to vector<1x4x1xf32>
    %38 = vector.shape_cast %37 : vector<1x4x1xf32> to vector<1x4x1x1xf32>
    %c0_41 = arith.constant 0 : index
    %c0_42 = arith.constant 0 : index
    %c1_43 = arith.constant 1 : index
    %c1_44 = arith.constant 1 : index
    %39 = vector.load %arg4[%c0_41, %c0_42, %c1_43, %c1_44] : memref<1x4x4x4xf32, #tpu.memory_space<vmem>>, vector<1x4x1x1xf32>
    tpu.vector_store %arg4[%c0_41, %c0_42, %c1_43, %c1_44], %38 {strides = array<i32>} : memref<1x4x4x4xf32, #tpu.memory_space<vmem>>, vector<1x4x1x1xf32>,
    %40 = vector.extract_strided_slice %31 {offsets = [0, 0, 0, 8], sizes = [1, 4, 1, 4], strides = [1, 1, 1, 1]} : vector<1x4x1x16xf32> to vector<1x4x1x4xf32>
    %cst_45 = arith.constant dense<0xFF800000> : vector<1x4x1xf32>
    %41 = vector.multi_reduction <maximumf>, %40, %cst_45 [3] : vector<1x4x1x4xf32> to vector<1x4x1xf32>
    %42 = vector.shape_cast %41 : vector<1x4x1xf32> to vector<1x4x1x1xf32>
    %c0_46 = arith.constant 0 : index
    %c0_47 = arith.constant 0 : index
    %c1_48 = arith.constant 1 : index
    %c2_49 = arith.constant 2 : index
    %43 = vector.load %arg4[%c0_46, %c0_47, %c1_48, %c2_49] : memref<1x4x4x4xf32, #tpu.memory_space<vmem>>, vector<1x4x1x1xf32>
    tpu.vector_store %arg4[%c0_46, %c0_47, %c1_48, %c2_49], %42 {strides = array<i32>} : memref<1x4x4x4xf32, #tpu.memory_space<vmem>>, vector<1x4x1x1xf32>,
    %44 = vector.extract_strided_slice %31 {offsets = [0, 0, 0, 12], sizes = [1, 4, 1, 4], strides = [1, 1, 1, 1]} : vector<1x4x1x16xf32> to vector<1x4x1x4xf32>
    %cst_50 = arith.constant dense<0xFF800000> : vector<1x4x1xf32>
    %45 = vector.multi_reduction <maximumf>, %44, %cst_50 [3] : vector<1x4x1x4xf32> to vector<1x4x1xf32>
    %46 = vector.shape_cast %45 : vector<1x4x1xf32> to vector<1x4x1x1xf32>
    %c0_51 = arith.constant 0 : index
    %c0_52 = arith.constant 0 : index
    %c1_53 = arith.constant 1 : index
    %c3_54 = arith.constant 3 : index
    %47 = vector.load %arg4[%c0_51, %c0_52, %c1_53, %c3_54] : memref<1x4x4x4xf32, #tpu.memory_space<vmem>>, vector<1x4x1x1xf32>
    tpu.vector_store %arg4[%c0_51, %c0_52, %c1_53, %c3_54], %46 {strides = array<i32>} : memref<1x4x4x4xf32, #tpu.memory_space<vmem>>, vector<1x4x1x1xf32>,
    %c0_55 = arith.constant 0 : index
    %c0_56 = arith.constant 0 : index
    %c8 = arith.constant 8 : index
    %c0_57 = arith.constant 0 : index
    %48 = vector.load %arg2[%c0_55, %c0_56, %c8, %c0_57] : memref<1x4x16x16xf32, #tpu.memory_space<vmem>>, vector<1x4x4x16xf32>
    %c0_58 = arith.constant 0 : index
    %c0_59 = arith.constant 0 : index
    %c8_60 = arith.constant 8 : index
    %c0_61 = arith.constant 0 : index
    %49 = vector.load %arg3[%c0_58, %c0_59, %c8_60, %c0_61] : memref<1x4x16x16xi8, #tpu.memory_space<vmem>>, vector<1x4x4x16xi8>
    %c0_i8_62 = arith.constant 0 : i8
    %50 = vector.broadcast %c0_i8_62 : i8 to vector<1x4x4x16xi8>
    %51 = arith.cmpi ne, %49, %50 : vector<1x4x4x16xi8>
    %cst_63 = arith.constant -1.000000e+04 : f32
    %52 = vector.broadcast %cst_63 : f32 to vector<1x4x4x16xf32>
    %53 = arith.select %51, %48, %52 : vector<1x4x4x16xi1>, vector<1x4x4x16xf32>
    %cst_64 = arith.constant dense<0xFF800000> : vector<1x4x16xf32>
    %54 = vector.multi_reduction <maximumf>, %53, %cst_64 [2] : vector<1x4x4x16xf32> to vector<1x4x16xf32>
    %55 = vector.shape_cast %54 : vector<1x4x16xf32> to vector<1x4x1x16xf32>
    %56 = vector.extract_strided_slice %55 {offsets = [0, 0, 0, 0], sizes = [1, 4, 1, 4], strides = [1, 1, 1, 1]} : vector<1x4x1x16xf32> to vector<1x4x1x4xf32>
    %cst_65 = arith.constant dense<0xFF800000> : vector<1x4x1xf32>
    %57 = vector.multi_reduction <maximumf>, %56, %cst_65 [3] : vector<1x4x1x4xf32> to vector<1x4x1xf32>
    %58 = vector.shape_cast %57 : vector<1x4x1xf32> to vector<1x4x1x1xf32>
    %c0_66 = arith.constant 0 : index
    %c0_67 = arith.constant 0 : index
    %c2_68 = arith.constant 2 : index
    %c0_69 = arith.constant 0 : index
    %59 = vector.load %arg4[%c0_66, %c0_67, %c2_68, %c0_69] : memref<1x4x4x4xf32, #tpu.memory_space<vmem>>, vector<1x4x1x1xf32>
    tpu.vector_store %arg4[%c0_66, %c0_67, %c2_68, %c0_69], %58 {strides = array<i32>} : memref<1x4x4x4xf32, #tpu.memory_space<vmem>>, vector<1x4x1x1xf32>,
    %60 = vector.extract_strided_slice %55 {offsets = [0, 0, 0, 4], sizes = [1, 4, 1, 4], strides = [1, 1, 1, 1]} : vector<1x4x1x16xf32> to vector<1x4x1x4xf32>
    %cst_70 = arith.constant dense<0xFF800000> : vector<1x4x1xf32>
    %61 = vector.multi_reduction <maximumf>, %60, %cst_70 [3] : vector<1x4x1x4xf32> to vector<1x4x1xf32>
    %62 = vector.shape_cast %61 : vector<1x4x1xf32> to vector<1x4x1x1xf32>
    %c0_71 = arith.constant 0 : index
    %c0_72 = arith.constant 0 : index
    %c2_73 = arith.constant 2 : index
    %c1_74 = arith.constant 1 : index
    %63 = vector.load %arg4[%c0_71, %c0_72, %c2_73, %c1_74] : memref<1x4x4x4xf32, #tpu.memory_space<vmem>>, vector<1x4x1x1xf32>
    tpu.vector_store %arg4[%c0_71, %c0_72, %c2_73, %c1_74], %62 {strides = array<i32>} : memref<1x4x4x4xf32, #tpu.memory_space<vmem>>, vector<1x4x1x1xf32>,
    %64 = vector.extract_strided_slice %55 {offsets = [0, 0, 0, 8], sizes = [1, 4, 1, 4], strides = [1, 1, 1, 1]} : vector<1x4x1x16xf32> to vector<1x4x1x4xf32>
    %cst_75 = arith.constant dense<0xFF800000> : vector<1x4x1xf32>
    %65 = vector.multi_reduction <maximumf>, %64, %cst_75 [3] : vector<1x4x1x4xf32> to vector<1x4x1xf32>
    %66 = vector.shape_cast %65 : vector<1x4x1xf32> to vector<1x4x1x1xf32>
    %c0_76 = arith.constant 0 : index
    %c0_77 = arith.constant 0 : index
    %c2_78 = arith.constant 2 : index
    %c2_79 = arith.constant 2 : index
    %67 = vector.load %arg4[%c0_76, %c0_77, %c2_78, %c2_79] : memref<1x4x4x4xf32, #tpu.memory_space<vmem>>, vector<1x4x1x1xf32>
    tpu.vector_store %arg4[%c0_76, %c0_77, %c2_78, %c2_79], %66 {strides = array<i32>} : memref<1x4x4x4xf32, #tpu.memory_space<vmem>>, vector<1x4x1x1xf32>,
    %68 = vector.extract_strided_slice %55 {offsets = [0, 0, 0, 12], sizes = [1, 4, 1, 4], strides = [1, 1, 1, 1]} : vector<1x4x1x16xf32> to vector<1x4x1x4xf32>
    %cst_80 = arith.constant dense<0xFF800000> : vector<1x4x1xf32>
    %69 = vector.multi_reduction <maximumf>, %68, %cst_80 [3] : vector<1x4x1x4xf32> to vector<1x4x1xf32>
    %70 = vector.shape_cast %69 : vector<1x4x1xf32> to vector<1x4x1x1xf32>
    %c0_81 = arith.constant 0 : index
    %c0_82 = arith.constant 0 : index
    %c2_83 = arith.constant 2 : index
    %c3_84 = arith.constant 3 : index
    %71 = vector.load %arg4[%c0_81, %c0_82, %c2_83, %c3_84] : memref<1x4x4x4xf32, #tpu.memory_space<vmem>>, vector<1x4x1x1xf32>
    tpu.vector_store %arg4[%c0_81, %c0_82, %c2_83, %c3_84], %70 {strides = array<i32>} : memref<1x4x4x4xf32, #tpu.memory_space<vmem>>, vector<1x4x1x1xf32>,
    %c0_85 = arith.constant 0 : index
    %c0_86 = arith.constant 0 : index
    %c12 = arith.constant 12 : index
    %c0_87 = arith.constant 0 : index
    %72 = vector.load %arg2[%c0_85, %c0_86, %c12, %c0_87] : memref<1x4x16x16xf32, #tpu.memory_space<vmem>>, vector<1x4x4x16xf32>
    %c0_88 = arith.constant 0 : index
    %c0_89 = arith.constant 0 : index
    %c12_90 = arith.constant 12 : index
    %c0_91 = arith.constant 0 : index
    %73 = vector.load %arg3[%c0_88, %c0_89, %c12_90, %c0_91] : memref<1x4x16x16xi8, #tpu.memory_space<vmem>>, vector<1x4x4x16xi8>
    %c0_i8_92 = arith.constant 0 : i8
    %74 = vector.broadcast %c0_i8_92 : i8 to vector<1x4x4x16xi8>
    %75 = arith.cmpi ne, %73, %74 : vector<1x4x4x16xi8>
    %cst_93 = arith.constant -1.000000e+04 : f32
    %76 = vector.broadcast %cst_93 : f32 to vector<1x4x4x16xf32>
    %77 = arith.select %75, %72, %76 : vector<1x4x4x16xi1>, vector<1x4x4x16xf32>
    %cst_94 = arith.constant dense<0xFF800000> : vector<1x4x16xf32>
    %78 = vector.multi_reduction <maximumf>, %77, %cst_94 [2] : vector<1x4x4x16xf32> to vector<1x4x16xf32>
    %79 = vector.shape_cast %78 : vector<1x4x16xf32> to vector<1x4x1x16xf32>
    %80 = vector.extract_strided_slice %79 {offsets = [0, 0, 0, 0], sizes = [1, 4, 1, 4], strides = [1, 1, 1, 1]} : vector<1x4x1x16xf32> to vector<1x4x1x4xf32>
    %cst_95 = arith.constant dense<0xFF800000> : vector<1x4x1xf32>
    %81 = vector.multi_reduction <maximumf>, %80, %cst_95 [3] : vector<1x4x1x4xf32> to vector<1x4x1xf32>
    %82 = vector.shape_cast %81 : vector<1x4x1xf32> to vector<1x4x1x1xf32>
    %c0_96 = arith.constant 0 : index
    %c0_97 = arith.constant 0 : index
    %c3_98 = arith.constant 3 : index
    %c0_99 = arith.constant 0 : index
    %83 = vector.load %arg4[%c0_96, %c0_97, %c3_98, %c0_99] : memref<1x4x4x4xf32, #tpu.memory_space<vmem>>, vector<1x4x1x1xf32>
    tpu.vector_store %arg4[%c0_96, %c0_97, %c3_98, %c0_99], %82 {strides = array<i32>} : memref<1x4x4x4xf32, #tpu.memory_space<vmem>>, vector<1x4x1x1xf32>,
    %84 = vector.extract_strided_slice %79 {offsets = [0, 0, 0, 4], sizes = [1, 4, 1, 4], strides = [1, 1, 1, 1]} : vector<1x4x1x16xf32> to vector<1x4x1x4xf32>
    %cst_100 = arith.constant dense<0xFF800000> : vector<1x4x1xf32>
    %85 = vector.multi_reduction <maximumf>, %84, %cst_100 [3] : vector<1x4x1x4xf32> to vector<1x4x1xf32>
    %86 = vector.shape_cast %85 : vector<1x4x1xf32> to vector<1x4x1x1xf32>
    %c0_101 = arith.constant 0 : index
    %c0_102 = arith.constant 0 : index
    %c3_103 = arith.constant 3 : index
    %c1_104 = arith.constant 1 : index
    %87 = vector.load %arg4[%c0_101, %c0_102, %c3_103, %c1_104] : memref<1x4x4x4xf32, #tpu.memory_space<vmem>>, vector<1x4x1x1xf32>
    tpu.vector_store %arg4[%c0_101, %c0_102, %c3_103, %c1_104], %86 {strides = array<i32>} : memref<1x4x4x4xf32, #tpu.memory_space<vmem>>, vector<1x4x1x1xf32>,
    %88 = vector.extract_strided_slice %79 {offsets = [0, 0, 0, 8], sizes = [1, 4, 1, 4], strides = [1, 1, 1, 1]} : vector<1x4x1x16xf32> to vector<1x4x1x4xf32>
    %cst_105 = arith.constant dense<0xFF800000> : vector<1x4x1xf32>
    %89 = vector.multi_reduction <maximumf>, %88, %cst_105 [3] : vector<1x4x1x4xf32> to vector<1x4x1xf32>
    %90 = vector.shape_cast %89 : vector<1x4x1xf32> to vector<1x4x1x1xf32>
    %c0_106 = arith.constant 0 : index
    %c0_107 = arith.constant 0 : index
    %c3_108 = arith.constant 3 : index
    %c2_109 = arith.constant 2 : index
    %91 = vector.load %arg4[%c0_106, %c0_107, %c3_108, %c2_109] : memref<1x4x4x4xf32, #tpu.memory_space<vmem>>, vector<1x4x1x1xf32>
    tpu.vector_store %arg4[%c0_106, %c0_107, %c3_108, %c2_109], %90 {strides = array<i32>} : memref<1x4x4x4xf32, #tpu.memory_space<vmem>>, vector<1x4x1x1xf32>,
    %92 = vector.extract_strided_slice %79 {offsets = [0, 0, 0, 12], sizes = [1, 4, 1, 4], strides = [1, 1, 1, 1]} : vector<1x4x1x16xf32> to vector<1x4x1x4xf32>
    %cst_110 = arith.constant dense<0xFF800000> : vector<1x4x1xf32>
    %93 = vector.multi_reduction <maximumf>, %92, %cst_110 [3] : vector<1x4x1x4xf32> to vector<1x4x1xf32>
    %94 = vector.shape_cast %93 : vector<1x4x1xf32> to vector<1x4x1x1xf32>
    %c0_111 = arith.constant 0 : index
    %c0_112 = arith.constant 0 : index
    %c3_113 = arith.constant 3 : index
    %c3_114 = arith.constant 3 : index
    %95 = vector.load %arg4[%c0_111, %c0_112, %c3_113, %c3_114] : memref<1x4x4x4xf32, #tpu.memory_space<vmem>>, vector<1x4x1x1xf32>
    tpu.vector_store %arg4[%c0_111, %c0_112, %c3_113, %c3_114], %94 {strides = array<i32>} : memref<1x4x4x4xf32, #tpu.memory_space<vmem>>, vector<1x4x1x1xf32>,
    return
  }
  func.func @transform_0(%arg0: i32, %arg1: i32) -> (i32, i32, i32, i32) {
    %c0_i32 = arith.constant 0 : i32
    %c0_i32_0 = arith.constant 0 : i32
    %c0_i32_1 = arith.constant 0 : i32
    return %arg0, %arg1, %c0_i32, %c0_i32_0 : i32, i32, i32, i32
  }
  func.func @transform_1(%arg0: i32, %arg1: i32) -> (i32, i32, i32, i32) {
    %c0_i32 = arith.constant 0 : i32
    %c0_i32_0 = arith.constant 0 : i32
    %c0_i32_1 = arith.constant 0 : i32
    return %arg0, %arg1, %c0_i32, %c0_i32_0 : i32, i32, i32, i32
  }
  func.func @transform_2(%arg0: i32, %arg1: i32) -> (i32, i32, i32, i32) {
    %c0_i32 = arith.constant 0 : i32
    %c0_i32_0 = arith.constant 0 : i32
    %c0_i32_1 = arith.constant 0 : i32
    return %arg0, %arg1, %c0_i32, %c0_i32_0 : i32, i32, i32, i32
  }
}

</mosaic_0001>

<bundles_post_ra>
// kernel: tpu_custom_call.1
= control target key start
LH: loop header
LB: loop body
LE: loop exit
PB: predicated region body
PF: predicated region fallthrough
CT: control target
= control target key end

     0   :  { %7 = vsyncpa [#allocation3], 0  ;;  %s1765_s0 = inlined_call_operand.hbm [shape: f32[2,4,16,16], index: 0, kind: input, shape index: {}]   ;;  %s1766_s1 = inlined_call_operand.hbm [shape: s8[2,4,16,16], index: 1, kind: input, shape index: {}]   ;;  %s1767_s2 = inlined_call_operand.hbm [shape: f32[2,4,4,4], index: 2, kind: output, shape index: {}]  }
   0x1   :  { %9 = vsyncpa [#allocation3 + $0x1], 0 }
   0x2   :  { %10 = vsyncpa [#allocation6], 0 }
   0x3   :  { %12 = vsyncpa [#allocation6 + $0x1], 0 }
   0x4   :  { %13 = vsyncpa [#allocation4], 0 }
   0x5   :  { %15 = vsyncpa [#allocation4 + $0x1], 0  ;;  %s1142_s9 = smov 0   ;;  %s1144_s10 = smov 0  }
   0x6   :  { %s1146_s11 = smov 0   ;;  %s1148_s12 = smov 0  }
   0x7   :  { %s1150_s13 = smov 0   ;;  %s1152_s14 = smov 0  }
   0x8 LB: > { %s873_s15 = sadd.s32 4294967295, %s1115_s14   ;;  %s874_s16 = sadd.s32 4294967294, %s1115_s14   ;;  %s1115_s14 = sphi %s1152_s14, %s21_s14   ;;  %s1111_s13 = sphi %s1150_s13, %s1797_s13   ;;  %s1107_s12 = sphi %s1148_s12, %s1796_s12   ;;  %s1103_s11 = sphi %s1146_s11, %s1795_s11   ;;  %s1099_s10 = sphi %s1144_s10, %s1794_s10   ;;  %s1095_s9 = sphi %s1142_s9, %s1793_s9  }
   0x9   : > { %s33_s17 = sadd.s32 1, %s1111_s13  ;;  %s42_s18 = sadd.s32 1, %s1103_s11 }
   0xa   : > { %p35_p0 = scmp.ge.s32.totalorder %s33_s17, 2  ;;  %p49_p1 = scmp.ne.s32.totalorder %s1103_s11, %s1099_s10 }
   0xb   : > { %p50_p2 = scmp.eq.s32.totalorder %s1115_s14, 0  ;;  %p55_p3 = scmp.ne.s32.totalorder %s1099_s10, %s1095_s9 }
   0xc   : > { %s1799_s17 = smov (%p35_p0, %s33_s17), 0  ;;  %p56_p5 = scmp.eq.s32.totalorder %s873_s15, 0 }
   0xd   : > { %p1183_p4 = por %p50_p2, %p49_p1  ;;  %s37_s20 = ssub.s32 %s1111_s13, %s1799_s17 }
   0xe   : > { %p109_p6 = scmp.eq.s32.totalorder %s873_s15, 1  ;;  %p40_p7 = scmp.eq.s32.totalorder %s37_s20, 0 }
   0xf   : > { %p1189_p8 = por %p56_p5, %p55_p3  ;;  %p115_p10 = scmp.eq.s32.totalorder %s874_s16, 1 }
  0x10   : > { %p1193_p9 = por %p109_p6, %p49_p1  ;;  %p912_p13 = scmp.lt.s32.totalorder %s1115_s14, 2 }
  0x11   : > { %s1771_s21 = scalar_select %p1189_p8, 1, 0 }
  0x12   : > { %s1772_s22 = scalar_select %p1193_p9, 1, 0 }
  0x13   : > { %s1198_s23 = scalar_select %p40_p7, %s1103_s11, %s42_s18  }
  0x14   : > { %p1200_p11 = por %p115_p10, %p55_p3  ;;  %s1207_s25 = sand.u32 1, %s1103_s11  }
  0x15   : > { %s877_s26 = sshll.u32 %s1207_s25, 6  ;;  %s892_s27 = sshll.u32 %s1111_s13, 10 }
  0x16   : > { %s1773_s24 = scalar_select %p1200_p11, 1, 0 }
  0x17   : > { %s1214_s30 = scalar_lea.hbm %s1765_s0, %s892_s27  ;;  %s139_s3 = scalar_lea.vmem [#allocation2], %s877_s26 }
  0x18   : > { %s149_s4 = sshll.u32 %s139_s3, 4  ;;  %p1220_p0 = pnand %p912_p13, %p1183_p4  ;;  %s1216_s4 = int_to_ptr.vmem [resolvable:$true] %s149_s4 }
  0x19   : > { %s136_s6 = scalar_lea.sflag [#allocation3], %s1207_s25  ;;  %s969_s7 = scalar_lea.hbm %s1214_s30, 1024 }
  0x1a   : > { %p970_p2 = scmp.ne.s32.totalorder %s1214_s30, %s969_s7  ;;  %p971_p3 = pneg %p1220_p0 }
  0x1b   : > { %s974_s16 = scalar_lea.hbm %s1765_s0, 2048  ;;  %p975_p4 = scmp.lt.u32.totalorder %s1214_s30, %s1765_s0 }
  0x1c   : > { %p972_p5 = pnand %p971_p3, %p970_p2  ;;  %p976_p7 = scmp.lt.u32.totalorder %s974_s16, %s969_s7 }
  0x1d   : > { %p978_p13 = scmp.lt.u32.totalorder %s969_s7, %s1214_s30 }
  0x1e   : > { %p973_p6 = pneg %p972_p5  ;;  %p977_p10 = por %p976_p7, %p975_p4 }
  0x20   : > { %p979_p12 = por %p978_p13, %p977_p10 }
  0x22   : > { %p980_p1 = pnand %p979_p12, %p973_p6 }
  0x24   : > { %983 = shalt.err (!%p980_p1)
}
  0x25   : > { %s984_s20 = scalar_lea.vmem %s1216_s4, 1024  ;;  %s1117_s26 = smov [#allocation2]  }
  0x26   : > { %p985_p2 = scmp.ne.s32.totalorder %s1216_s4, %s984_s20  ;;  %s989_s27 = sshll.u32 %s1117_s26, 4  ;;  %s990_s27 = int_to_ptr.vmem [resolvable:$false] %s989_s27 }
  0x27   : > { %s991_s28 = scalar_lea.vmem %s990_s27, 2048  ;;  %p992_p9 = scmp.lt.s32.totalorder %s1216_s4, %s990_s27 }
  0x28   : > { %p987_p5 = pnand %p985_p2, %p971_p3  ;;  %p993_p4 = scmp.lt.s32.totalorder %s991_s28, %s984_s20 }
  0x2a   : > { %p988_p11 = pneg %p987_p5  ;;  %p994_p7 = por %p993_p4, %p992_p9 }
  0x2c   : > { %p995_p10 = pnand %p994_p7, %p988_p11 }
  0x2e   : > { %998 = shalt.err (!%p995_p10)
}
  0x2f   : > { %s1118_s29 = smov 128   ;;  %s1119_s3 = smov 8  }
  0x30   : > { %904 = dma.hbm_to_vmem [thread:$0]  (!%p1220_p0), %s1214_s30, 1024, %s1216_s4, %s136_s6, %s1118_s29, %s1118_s29, %s1119_s3  }
  0x31   : > { %p181_p12 = scmp.lt.s32.totalorder %s1115_s14, 3  ;;  %s880_s7 = sshll.u32 %s1207_s25, 4 }
  0x32   : > { %s893_s8 = sshll.u32 %s1111_s13, 8  ;;  %p1775_p9 = scmp.ge.s32.totalorder %s1115_s14, 1 }
  0x33   : > { %s1265_s19 = scalar_lea.hbm %s1766_s1, %s893_s8  ;;  %s163_s20 = scalar_lea.vmem [#allocation5], %s880_s7 }
  0x34   : > { %p1258_p11 = pnand %p1775_p9, %p181_p12  ;;  %s173_s26 = sshll.u32 %s163_s20, 4  ;;  %s1267_s26 = int_to_ptr.vmem [resolvable:$true] %s173_s26 }
  0x35   : > { %s160_s30 = scalar_lea.sflag [#allocation6], %s1207_s25  ;;  %s999_s4 = scalar_lea.hbm %s1265_s19, 256 }
  0x36   : > { %p1000_p1 = scmp.ne.s32.totalorder %s1265_s19, %s999_s4  ;;  %s1004_s28 = scalar_lea.hbm %s1766_s1, 512 }
  0x37   : > { %p1005_p2 = scmp.lt.u32.totalorder %s1265_s19, %s1766_s1  ;;  %p1006_p5 = scmp.lt.u32.totalorder %s1004_s28, %s999_s4 }
  0x38   : > { %p1002_p6 = pnand %p1000_p1, %p971_p3  ;;  %p1008_p7 = scmp.lt.u32.totalorder %s999_s4, %s1265_s19 }
  0x39   : > { %p1007_p4 = por %p1006_p5, %p1005_p2 }
  0x3a   : > { %p1003_p13 = pneg %p1002_p6 }
  0x3b   : > { %p1009_p10 = por %p1008_p7, %p1007_p4 }
  0x3d   : > { %p1010_p12 = pnand %p1009_p10, %p1003_p13 }
  0x3f   : > { %1013 = shalt.err (!%p1010_p12)
}
  0x40   : > { %s1014_s7 = scalar_lea.vmem %s1267_s26, 256  ;;  %s1120_s8 = smov [#allocation5]  }
  0x41   : > { %p1015_p9 = scmp.ne.s32.totalorder %s1267_s26, %s1014_s7  ;;  %s1019_s16 = sshll.u32 %s1120_s8, 4  ;;  %s1020_s16 = int_to_ptr.vmem [resolvable:$false] %s1019_s16 }
  0x42   : > { %s1021_s18 = scalar_lea.vmem %s1020_s16, 512  ;;  %p1022_p8 = scmp.lt.s32.totalorder %s1267_s26, %s1020_s16 }
  0x43   : > { %p1017_p1 = pnand %p1015_p9, %p971_p3  ;;  %p1023_p2 = scmp.lt.s32.totalorder %s1021_s18, %s1014_s7 }
  0x45   : > { %p1018_p6 = pneg %p1017_p1  ;;  %p1024_p5 = por %p1023_p2, %p1022_p8 }
  0x47   : > { %p1025_p4 = pnand %p1024_p5, %p1018_p6 }
  0x49   : > { %1028 = shalt.err (!%p1025_p4)
}
  0x4a   : > { %s1121_s20 = smov 32   ;;  %s1122_s4 = smov 2  }
  0x4b   : > { %907 = dma.hbm_to_vmem [thread:$0]  (!%p1220_p0), %s1265_s19, 256, %s1267_s26, %s160_s30, %s1121_s20, %s1121_s20, %s1122_s4  }
  0x4c   : > { %185 = sbr.rel (%p1258_p11) target bundleno = 390 (0x186), region = 28  ;;  %s1298_s6 = sand.u32 (!%p1258_p11), 1, %s1099_s10  }
  0x4d   : > { %s884_s27 = sshll.u32 (!%p1258_p11), %s1298_s6, 6  ;;  %s188_s28 = scalar_lea.sflag (!%p1258_p11), [#allocation3], %s1298_s6 }
  0x4e   : > { %s1302_s29 = scalar_lea.vmem (!%p1258_p11), [#allocation2], %s884_s27  ;;  %p1777_p8 = scmp.ne.s32.totalorder (!%p1258_p11), %s1771_s21, 0 }
  0x53   : > { %1082 = dma.done.wait (%p1777_p8), %s188_s28, 1024  }
  0x54   : > { %1084 = vsyncadd (%p1777_p8), %s188_s28, 4294966272  ;;  %s885_s25 = sshll.u32 %s1298_s6, 4  ;;  %s197_s5 = scalar_lea.sflag [#allocation6], %s1298_s6 }
  0x55   : > { %s1312_s15 = scalar_lea.vmem [#allocation5], %s885_s25 }
  0x56   : > { %1086 = dma.done.wait (%p1777_p8), %s197_s5, 256  }
  0x57   : > { %1088 = vsyncadd (%p1777_p8), %s197_s5, 4294967040  ;;  %v237_v0 = vld [vmem:[%s1312_s15 + $0x8] sm:$0x1]  ;;  %vm259_vm1 = vcmask 125952   ;;  %v235_v1 = vld [vmem:[%s1312_s15] sm:$0x1] }
  0x58   : > { %vm241_vm0 = vnez %v237_v0  ;;  %v238_v2 = vld [vmem:[%s1312_s15 + $0xc] sm:$0x1]  ;;  %v233_v3 = vld [vmem:[%s1302_s29 + $0x20] sm:$0xf]  ;;  %v1123_v4 = vmov 0   ;;  %vm239_vm2 = vnez %v235_v1  ;;  %vm288_vm15 = vcmask 31744  }
  0x59   : > { %v245_v5 = vsel %vm241_vm0, 16843009, %v1123_v4  ;;  %vm242_vm3 = vnez %v238_v2  ;;  %v236_v6 = vld [vmem:[%s1312_s15 + $0x4] sm:$0x1]  ;;  %v231_v8 = vld [vmem:[%s1302_s29] sm:$0xf] }
  0x5a   : > { %v249_v7 = vunpack.c.0.s8 %v245_v5  ;;  %v243_v9 = vsel %vm239_vm2, 16843009, %v1123_v4  ;;  %v246_v10 = vsel %vm242_vm3, 16843009, %v1123_v4  ;;  %vm240_vm4 = vnez %v236_v6  ;;  %v234_v12 = vld [vmem:[%s1302_s29 + $0x30] sm:$0xf] }
  0x5b   : > { %v247_v11 = vunpack.c.0.s8 %v243_v9  ;;  %v250_v13 = vunpack.c.0.s8 %v246_v10  ;;  %v244_v14 = vsel %vm240_vm4, 16843009, %v1123_v4  ;;  %v365_v15 = vld [vmem:[%s1312_s15 + $0x4] sm:$0x2]  ;;  %v232_v16 = vld [vmem:[%s1302_s29 + $0x10] sm:$0xf] }
  0x5c   : > { %vm253_vm5 = vcmp.ne.s32.totalorder %v249_v7, 0  ;;  %v248_v17 = vunpack.c.0.s8 %v244_v14  ;;  %vm369_vm6 = vnez %v365_v15  ;;  %v364_v18 = vld [vmem:[%s1312_s15] sm:$0x2]  ;;  %v367_v24 = vld [vmem:[%s1312_s15 + $0xc] sm:$0x2]  ;;  %vm306_vm3 = vcmask 64544  }
  0x5d   : > { %v257_v19 = vsel %vm253_vm5, %v233_v3, -10000.0  ;;  %vm251_vm7 = vcmp.ne.s32.totalorder %v247_v11, 0  ;;  %vm254_vm8 = vcmp.ne.s32.totalorder %v250_v13, 0  ;;  %v373_v20 = vsel %vm369_vm6, 16843009, %v1123_v4  ;;  %s1579_s21 = scalar_lea.vmem [#allocation7], %s885_s25 }
  0x5e   : > { %v274_v21 = vsel %vm259_vm1, %v257_v19, -inf  ;;  %v255_v22 = vsel %vm251_vm7, %v231_v8, -10000.0  ;;  %v258_v23 = vsel %vm254_vm8, %v234_v12, -10000.0  ;;  %vm252_vm9 = vcmp.ne.s32.totalorder %v248_v17, 0  ;;  %v361_v40 = vld [vmem:[%s1302_s29 + $0x14] sm:$0xf] }
  0x5f   : > { %v275_v25 = vrot.slane %v274_v21, 4  ;;  %v260_v26 = vsel %vm259_vm1, %v255_v22, -inf  ;;  %v281_v27 = vsel %vm259_vm1, %v258_v23, -inf  ;;  %v256_v28 = vsel %vm252_vm9, %v232_v16, -10000.0  ;;  %v360_v62 = vld [vmem:[%s1302_s29 + $0x4] sm:$0xf] }
  0x60   : > { %v261_v29 = vrot.slane %v260_v26, 4  ;;  %v282_v30 = vrot.slane %v281_v27, 4  ;;  %v267_v31 = vsel %vm259_vm1, %v256_v28, -inf  ;;  %v377_v32 = vunpack.c.0.s8 %v373_v20  ;;  %v366_v9 = vld [vmem:[%s1312_s15 + $0x8] sm:$0x2]  ;;  %s894_s19 = sshll.u32 %s1107_s12, 8 }
  0x61   : > { %v276_v33 = vmax.f32 %v274_v21, %v275_v25  ;;  %v268_v34 = vrot.slane %v267_v31, 4  ;;  %vm368_vm10 = vnez %v364_v18  ;;  %vm371_vm11 = vnez %v367_v24  ;;  %v497_v12 = vld [vmem:[%s1312_s15 + $0x6] sm:$0x1]  ;;  %v496_v13 = vld [vmem:[%s1312_s15 + $0x2] sm:$0x1]  ;;  %s760_s26 = sshll.u32 %s1579_s21, 4  ;;  %s1710_s7 = scalar_lea.hbm %s1767_s2, %s894_s19  ;;  %s1712_s26 = int_to_ptr.vmem [resolvable:$true] %s760_s26 }
  0x62   : > { %v262_v35 = vmax.f32 %v260_v26, %v261_v29  ;;  %v283_v36 = vmax.f32 %v281_v27, %v282_v30  ;;  %vm381_vm12 = vcmp.ne.s32.totalorder %v377_v32, 0  ;;  %v372_v37 = vsel %vm368_vm10, 16843009, %v1123_v4  ;;  %v363_v18 = vld [vmem:[%s1302_s29 + $0x34] sm:$0xf]  ;;  %s745_s12 = scalar_lea.sflag [#allocation4], %s1298_s6 }
  0x63   : > { %v277_v38 = vrot.slane %v276_v33, 2  ;;  %v269_v39 = vmax.f32 %v267_v31, %v268_v34  ;;  %v385_v41 = vsel %vm381_vm12, 1, %v1123_v4  ;;  %v376_v42 = vunpack.c.0.s8 %v372_v37  ;;  %v499_v28 = vld [vmem:[%s1312_s15 + $0xe] sm:$0x1]  ;;  %v362_v34 = vld [vmem:[%s1302_s29 + $0x24] sm:$0xf] }
  0x64   : > { %v263_v43 = vrot.slane %v262_v35, 2  ;;  %v284_v44 = vrot.slane %v283_v36, 2  ;;  %v389_v45 = vrot.slane %v385_v41, 4  ;;  %v375_v46 = vsel %vm371_vm11, 16843009, %v1123_v4  ;;  %s1029_s8 = scalar_lea.vmem %s1712_s26, 256 }
  0x65   : > { %v278_v47 = vmax.f32 %v276_v33, %v277_v38  ;;  %v270_v48 = vrot.slane %v269_v39, 2  ;;  %vm380_vm13 = vcmp.ne.s32.totalorder %v376_v42, 0  ;;  %v379_v49 = vunpack.c.0.s8 %v375_v46  ;;  %v492_v42 = vld [vmem:[%s1302_s29 + $0x8] sm:$0xf]  ;;  %p1030_p0 = scmp.ne.s32.totalorder %s1712_s26, %s1029_s8  ;;  %p1790_p3 = scmp.ne.s32.totalorder %s1772_s22, 0 }
  0x66   : > { %v264_v50 = vmax.f32 %v262_v35, %v263_v43  ;;  %v285_v51 = vmax.f32 %v283_v36, %v284_v44  ;;  %vm1342_vm14 = vcmp.ne.s32.totalorder %v389_v45, 0  ;;  %v384_v53 = vsel %vm380_vm13, 1, %v1123_v4  ;;  %v498_v45 = vld [vmem:[%s1312_s15 + $0xa] sm:$0x1]  ;;  %s1124_s16 = smov [#allocation7]  }
  0x67   : > { %v279_v54 = vrot.slane %v278_v47, 1  ;;  %v271_v55 = vmax.f32 %v269_v39, %v270_v48  ;;  %v397_v56 = vsel %vm1342_vm14, %v361_v40, -10000.0  ;;  %v388_v57 = vrot.slane %v384_v53, 4  ;;  %v493_v40 = vld [vmem:[%s1302_s29 + $0x18] sm:$0xf]  ;;  %p1031_p11 = pnand %p1030_p0, %p1790_p3  ;;  %s1033_s18 = sshll.u32 %s1124_s16, 4  ;;  %s1034_s18 = int_to_ptr.vmem [resolvable:$false] %s1033_s18 }
  0x68   : > { %v265_v58 = vrot.slane %v264_v50, 1  ;;  %v286_v59 = vrot.slane %v285_v51, 1  ;;  %vm383_vm2 = vcmp.ne.s32.totalorder %v379_v49, 0  ;;  %v407_v2 = vsel %vm259_vm1, %v397_v56, -inf  ;;  %s1035_s20 = scalar_lea.vmem %s1034_s18, 512  ;;  %p1036_p7 = scmp.lt.s32.totalorder %s1712_s26, %s1034_s18 }
  0x69   : > { %v1349_v60 = vmax.f32 %v278_v47, %v279_v54  ;;  %v272_v61 = vrot.slane %v271_v55, 1  ;;  %vm1352_vm0 = vcmp.ne.s32.totalorder %v388_v57, 0  ;;  %v387_v8 = vsel %vm383_vm2, 1, %v1123_v4  ;;  %v617_v57 = vld [vmem:[%s1312_s15 + $0x6] sm:$0x2]  ;;  %p1032_p13 = pneg %p1031_p11  ;;  %p1037_p10 = scmp.lt.s32.totalorder %s1035_s20, %s1029_s8 }
  0x6a   : > { %v1356_v0 = vmax.f32 %v264_v50, %v265_v58  ;;  %v1358_v1 = vmax.f32 %v285_v51, %v286_v59  ;;  %v396_v7 = vsel %vm1352_vm0, %v360_v62, -10000.0  ;;  %v408_v11 = vrot.slane %v407_v2, 4 }
  0x6b   : > { %v295_v3 = vsel %vm288_vm15, %v1349_v60, -inf  ;;  %v1363_v5 = vmax.f32 %v271_v55, %v272_v61  ;;  %v400_v17 = vsel %vm259_vm1, %v396_v7, -inf  ;;  %v391_v19 = vrot.slane %v387_v8, 4  ;;  %p1038_p12 = por %p1037_p10, %p1036_p7 }
  0x6c   : > { %296 = vmax.xlane.f32.xlu1 %v295_v3  ;;  %v289_v6 = vsel %vm288_vm15, %v1356_v0, -inf  ;;  %v298_v10 = vsel %vm288_vm15, %v1358_v1, -inf  ;;  %v307_v16 = vsel %vm306_vm3, %v1356_v0, -inf  ;;  %v401_v20 = vrot.slane %v400_v17, 4  ;;  %v495_v3 = vld [vmem:[%s1302_s29 + $0x38] sm:$0xf] }
  0x6d   : > { %290 = vmax.xlane.f32.xlu0 %v289_v6  ;;  %v292_v14 = vsel %vm288_vm15, %v1363_v5, -inf  ;;  %v310_v15 = vsel %vm306_vm3, %v1363_v5, -inf  ;;  %vm370_vm4 = vnez %v366_v9  ;;  %vm501_vm5 = vnez %v497_v12  ;;  %v616_v12 = vld [vmem:[%s1312_s15 + $0x2] sm:$0x2]  ;;  %p1039_p9 = pnand %p1038_p12, %p1032_p13 }
  0x6e   : > { %vm500_vm6 = vnez %v496_v13  ;;  %v409_v21 = vmax.f32 %v407_v2, %v408_v11  ;;  %vm395_vm7 = vcmp.ne.s32.totalorder %v391_v19, 0  ;;  %v374_v22 = vsel %vm370_vm4, 16843009, %v1123_v4 }
  0x6f   : > { %v505_v23 = vsel %vm501_vm5, 16843009, %v1123_v4  ;;  %v402_v24 = vmax.f32 %v400_v17, %v401_v20  ;;  %v399_v25 = vsel %vm395_vm7, %v363_v18, -10000.0  ;;  %v378_v26 = vunpack.c.0.s8 %v374_v22  ;;  %v614_v22 = vld [vmem:[%s1302_s29 + $0x2c] sm:$0xf] }
  0x70   : > { %299 = vmax.xlane.f32.xlu1 %v298_v10  ;;  %v509_v27 = vunpack.c.0.s8 %v505_v23  ;;  %v421_v29 = vsel %vm259_vm1, %v399_v25, -inf  ;;  %v504_v30 = vsel %vm500_vm6, 16843009, %v1123_v4  ;;  %v316_v31 = vsel %vm306_vm3, %v1358_v1, -inf }
  0x71   : > { %293 = vmax.xlane.f32.xlu0 %v292_v14  ;;  %v313_v32 = vsel %vm306_vm3, %v1349_v60, -inf  ;;  %vm324_vm8 = vcmask 97344   ;;  %vm382_vm9 = vcmp.ne.s32.totalorder %v378_v26, 0  ;;  %v422_v33 = vrot.slane %v421_v29, 4  ;;  %v619_v26 = vld [vmem:[%s1312_s15 + $0xe] sm:$0x2] }
  0x72   : > { %v386_v35 = vsel %vm382_vm9, 1, %v1123_v4  ;;  %v508_v36 = vunpack.c.0.s8 %v504_v30  ;;  %vm503_vm10 = vnez %v499_v28  ;;  %v410_v37 = vrot.slane %v409_v21, 2 }
  0x73   : > { %v403_v38 = vrot.slane %v402_v24, 2  ;;  %v390_v39 = vrot.slane %v386_v35, 4  ;;  %vm1395_vm11 = vcmp.ne.s32.totalorder %v509_v27, 0  ;;  %v507_v44 = vsel %vm503_vm10, 16843009, %v1123_v4 }
  0x74   : > { %311 = vmax.xlane.f32.xlu1 %v310_v15  ;;  %vm1400_vm13 = vcmp.ne.s32.totalorder %v508_v36, 0  ;;  %v328_v46 = vsel %vm324_vm8, %v1363_v5, -inf  ;;  %v423_v47 = vmax.f32 %v421_v29, %v422_v33  ;;  %v517_v49 = vsel %vm1395_vm11, %v493_v40, -10000.0  ;;  %v494_v15 = vld [vmem:[%s1302_s29 + $0x28] sm:$0xf] }
  0x75   : > { %308 = vmax.xlane.f32.xlu0 %v307_v16  ;;  %vm394_vm12 = vcmp.ne.s32.totalorder %v390_v39, 0  ;;  %v325_v50 = vsel %vm324_vm8, %v1356_v0, -inf  ;;  %v411_v51 = vmax.f32 %v409_v21, %v410_v37  ;;  %v404_v52 = vmax.f32 %v402_v24, %v403_v38  ;;  %v613_v35 = vld [vmem:[%s1302_s29 + $0x1c] sm:$0xf] }
  0x76   : > { %v398_v48 = vsel %vm394_vm12, %v362_v34, -10000.0  ;;  %v516_v55 = vsel %vm1400_vm13, %v492_v42, -10000.0  ;;  %v511_v56 = vunpack.c.0.s8 %v507_v44  ;;  %vm502_vm14 = vnez %v498_v45 }
  0x77   : > { %v414_v53 = vsel %vm259_vm1, %v398_v48, -inf  ;;  %vm342_vm0 = vcmask 130144   ;;  %v527_v58 = vsel %vm259_vm1, %v517_v49, -inf  ;;  %v334_v59 = vsel %vm324_vm8, %v1358_v1, -inf  ;;  %v612_v49 = vld [vmem:[%s1302_s29 + $0xc] sm:$0xf] }
  0x78   : > { %317 = vmax.xlane.f32.xlu1 %v316_v31  ;;  %v415_v54 = vrot.slane %v414_v53, 4  ;;  %v331_v61 = vsel %vm324_vm8, %v1349_v60, -inf  ;;  %v424_v62 = vrot.slane %v423_v47, 2  ;;  %v520_v2 = vsel %vm259_vm1, %v516_v55, -inf }
  0x79   : > { %314 = vmax.xlane.f32.xlu0 %v313_v32  ;;  %vm1423_vm2 = vcmp.ne.s32.totalorder %v511_v56, 0  ;;  %v506_v7 = vsel %vm502_vm14, 16843009, %v1123_v4  ;;  %vm621_vm4 = vnez %v617_v57  ;;  %v412_v8 = vrot.slane %v411_v51, 1 }
  0x7a   : > { %v416_v63 = vmax.f32 %v414_v53, %v415_v54  ;;  %v405_v9 = vrot.slane %v404_v52, 1  ;;  %v528_v11 = vrot.slane %v527_v58, 4  ;;  %v346_v13 = vsel %vm342_vm0, %v1363_v5, -inf }
  0x7b   : > { %v343_v14 = vsel %vm342_vm0, %v1356_v0, -inf  ;;  %v510_v16 = vunpack.c.0.s8 %v506_v7  ;;  %v425_v17 = vmax.f32 %v423_v47, %v424_v62  ;;  %v521_v18 = vrot.slane %v520_v2, 4 }
  0x7c   : > { %329 = vmax.xlane.f32.xlu1 %v328_v46  ;;  %v417_v10 = vrot.slane %v416_v63, 2  ;;  %v519_v19 = vsel %vm1423_vm2, %v495_v3, -10000.0  ;;  %v625_v20 = vsel %vm621_vm4, 16843009, %v1123_v4  ;;  %vm620_vm6 = vnez %v616_v12 }
  0x7d   : > { %326 = vmax.xlane.f32.xlu0 %v325_v50  ;;  %vm1437_vm5 = vcmp.ne.s32.totalorder %v510_v16, 0  ;;  %v629_v5 = vunpack.c.0.s8 %v625_v20  ;;  %v1441_v23 = vmax.f32 %v411_v51, %v412_v8  ;;  %v1443_v0 = vmax.f32 %v404_v52, %v405_v9 }
  0x7e   : > { %v418_v21 = vmax.f32 %v416_v63, %v417_v10  ;;  %v529_v24 = vmax.f32 %v527_v58, %v528_v11  ;;  %v518_v25 = vsel %vm1437_vm5, %v494_v15, -10000.0  ;;  %v352_v27 = vsel %vm342_vm0, %v1358_v1, -inf }
  0x7f   : > { %v541_v28 = vsel %vm259_vm1, %v519_v19, -inf  ;;  %vm633_vm7 = vcmp.ne.s32.totalorder %v629_v5, 0  ;;  %v624_v29 = vsel %vm620_vm6, 16843009, %v1123_v4  ;;  %v349_v30 = vsel %vm342_vm0, %v1349_v60, -inf }
  0x80   : > { %335 = vmax.xlane.f32.xlu1 %v334_v59  ;;  %v426_v31 = vrot.slane %v425_v17, 1  ;;  %v522_v32 = vmax.f32 %v520_v2, %v521_v18  ;;  %v534_v33 = vsel %vm259_vm1, %v518_v25, -inf  ;;  %v419_v34 = vrot.slane %v418_v21, 1  ;;  %v618_v60 = vld [vmem:[%s1312_s15 + $0xa] sm:$0x2] }
  0x81   : > { %332 = vmax.xlane.f32.xlu0 %v331_v61  ;;  %v637_v36 = vsel %vm633_vm7, 1, %v1123_v4  ;;  %v628_v37 = vunpack.c.0.s8 %v624_v29  ;;  %vm623_vm9 = vnez %v619_v26  ;;  %v431_v1 = vsel %vm288_vm15, %v1441_v23, -inf  ;;  %v615_v61 = vld [vmem:[%s1302_s29 + $0x3c] sm:$0xf] }
  0x82   : > { %v428_v38 = vsel %vm288_vm15, %v1443_v0, -inf  ;;  %v530_v39 = vrot.slane %v529_v24, 2  ;;  %v542_v40 = vrot.slane %v541_v28, 4  ;;  %v535_v41 = vrot.slane %v534_v33, 4 }
  0x83   : > { %v641_v42 = vrot.slane %v637_v36, 4  ;;  %vm632_vm10 = vcmp.ne.s32.totalorder %v628_v37, 0  ;;  %v627_v43 = vsel %vm623_vm9, 16843009, %v1123_v4  ;;  %v1463_v44 = vmax.f32 %v425_v17, %v426_v31 }
  0x84   : > { %347 = vmax.xlane.f32.xlu1 %v346_v13  ;;  %v523_v45 = vrot.slane %v522_v32, 2  ;;  %v636_v46 = vsel %vm632_vm10, 1, %v1123_v4  ;;  %v631_v47 = vunpack.c.0.s8 %v627_v43  ;;  %v1466_v48 = vmax.f32 %v418_v21, %v419_v34 }
  0x85   : > { %344 = vmax.xlane.f32.xlu0 %v343_v14  ;;  %vm645_vm11 = vcmp.ne.s32.totalorder %v641_v42, 0  ;;  %v640_v50 = vrot.slane %v636_v46, 4  ;;  %vm622_vm12 = vnez %v618_v60  ;;  %v543_v51 = vmax.f32 %v541_v28, %v542_v40 }
  0x86   : > { %v649_v52 = vsel %vm645_vm11, %v613_v35, -10000.0  ;;  %vm635_vm13 = vcmp.ne.s32.totalorder %v631_v47, 0  ;;  %v626_v53 = vsel %vm622_vm12, 16843009, %v1123_v4  ;;  %v536_v54 = vmax.f32 %v534_v33, %v535_v41 }
  0x87   : > { %v659_v55 = vsel %vm259_vm1, %v649_v52, -inf  ;;  %vm644_vm14 = vcmp.ne.s32.totalorder %v640_v50, 0  ;;  %v639_v56 = vsel %vm635_vm13, 1, %v1123_v4  ;;  %v437_v57 = vsel %vm288_vm15, %v1463_v44, -inf }
  0x88   : > { %353 = vmax.xlane.f32.xlu1 %v352_v27  ;;  %v660_v58 = vrot.slane %v659_v55, 4  ;;  %v648_v59 = vsel %vm644_vm14, %v612_v49, -10000.0  ;;  %v643_v62 = vrot.slane %v639_v56, 4  ;;  %v434_v63 = vsel %vm288_vm15, %v1466_v48, -inf }
  0x89   : > { %350 = vmax.xlane.f32.xlu0 %v349_v30  ;;  %v652_v2 = vsel %vm259_vm1, %v648_v59, -inf  ;;  %v630_v3 = vunpack.c.0.s8 %v626_v53  ;;  %v531_v6 = vmax.f32 %v529_v24, %v530_v39  ;;  %v524_v7 = vmax.f32 %v522_v32, %v523_v45 }
  0x8a   : > { %v653_v8 = vrot.slane %v652_v2, 4  ;;  %vm647_vm2 = vcmp.ne.s32.totalorder %v643_v62, 0  ;;  %v544_v9 = vrot.slane %v543_v51, 2  ;;  %v537_v10 = vrot.slane %v536_v54, 2 }
  0x8b   : > { %v651_v11 = vsel %vm647_vm2, %v615_v61, -10000.0  ;;  %vm634_vm4 = vcmp.ne.s32.totalorder %v630_v3, 0  ;;  %v447_v12 = vsel %vm306_vm3, %v1441_v23, -inf  ;;  %v661_v13 = vmax.f32 %v659_v55, %v660_v58 }
  0x8c   : > { %432 = vmax.xlane.f32.xlu1 %v431_v1  ;;  %v654_v14 = vmax.f32 %v652_v2, %v653_v8  ;;  %v673_v15 = vsel %vm259_vm1, %v651_v11, -inf  ;;  %v444_v16 = vsel %vm306_vm3, %v1443_v0, -inf  ;;  %v638_v18 = vsel %vm634_vm4, 1, %v1123_v4 }
  0x8d   : > { %429 = vmax.xlane.f32.xlu0 %v428_v38  ;;  %v674_v17 = vrot.slane %v673_v15, 4  ;;  %v453_v19 = vsel %vm306_vm3, %v1463_v44, -inf  ;;  %v532_v20 = vrot.slane %v531_v6, 1  ;;  %v525_v21 = vrot.slane %v524_v7, 1 }
  0x8e   : > { %v642_v5 = vrot.slane %v638_v18, 4  ;;  %v450_v24 = vsel %vm306_vm3, %v1466_v48, -inf  ;;  %v545_v25 = vmax.f32 %v543_v51, %v544_v9  ;;  %v538_v26 = vmax.f32 %v536_v54, %v537_v10 }
  0x8f   : > { %v675_v27 = vmax.f32 %v673_v15, %v674_v17  ;;  %v662_v28 = vrot.slane %v661_v13, 2  ;;  %v655_v29 = vrot.slane %v654_v14, 2  ;;  %v1491_v4 = vsel %vm342_vm0, %v1441_v23, -inf }
  0x90   : > { %438 = vmax.xlane.f32.xlu1 %v437_v57  ;;  %vm646_vm5 = vcmp.ne.s32.totalorder %v642_v5, 0  ;;  %v1495_v32 = vsel %vm342_vm0, %v1443_v0, -inf  ;;  %v1499_v33 = vsel %vm342_vm0, %v1463_v44, -inf  ;;  %v463_v34 = vsel %vm324_vm8, %v1441_v23, -inf }
  0x91   : > { %435 = vmax.xlane.f32.xlu0 %v434_v63  ;;  %v676_v30 = vrot.slane %v675_v27, 2  ;;  %v650_v31 = vsel %vm646_vm5, %v614_v22, -10000.0  ;;  %v1506_v36 = vsel %vm342_vm0, %v1466_v48, -inf  ;;  %v1508_v37 = vmax.f32 %v531_v6, %v532_v20 }
  0x92   : > { %v666_v35 = vsel %vm259_vm1, %v650_v31, -inf  ;;  %v1510_v1 = vmax.f32 %v524_v7, %v525_v21  ;;  %v546_v40 = vrot.slane %v545_v25, 1  ;;  %v539_v60 = vrot.slane %v538_v26, 1 }
  0x93   : > { %v677_v38 = vmax.f32 %v675_v27, %v676_v30  ;;  %v667_v39 = vrot.slane %v666_v35, 4  ;;  %v663_v41 = vmax.f32 %v661_v13, %v662_v28  ;;  %v656_v42 = vmax.f32 %v654_v14, %v655_v29 }
  0x94   : > { %448 = vmax.xlane.f32.xlu1 %v447_v12  ;;  %v460_v23 = vsel %vm324_vm8, %v1443_v0, -inf  ;;  %v551_v46 = vsel %vm288_vm15, %v1508_v37, -inf  ;;  %v548_v47 = vsel %vm288_vm15, %v1510_v1, -inf  ;;  %v1518_v51 = vmax.f32 %v545_v25, %v546_v40 }
  0x95   : > { %445 = vmax.xlane.f32.xlu0 %v444_v16  ;;  %v678_v43 = vrot.slane %v677_v38, 1  ;;  %v668_v45 = vmax.f32 %v666_v35, %v667_v39  ;;  %v1520_v52 = vmax.f32 %v538_v26, %v539_v60  ;;  %v664_v53 = vrot.slane %v663_v41, 1 }
  0x96   : > { %v657_v54 = vrot.slane %v656_v42, 1  ;;  %v557_v61 = vsel %vm288_vm15, %v1518_v51, -inf  ;;  %v567_v12 = vsel %vm306_vm3, %v1508_v37, -inf  ;;  %v564_v13 = vsel %vm306_vm3, %v1510_v1, -inf }
  0x97   : > { %v679_v49 = vmax.f32 %v677_v38, %v678_v43  ;;  %v669_v50 = vrot.slane %v668_v45, 2  ;;  %v665_v62 = vmax.f32 %v663_v41, %v664_v53  ;;  %v554_v63 = vsel %vm288_vm15, %v1520_v52, -inf }
  0x98   : > { %454 = vmax.xlane.f32.xlu1 %v453_v19  ;;  %v658_v2 = vmax.f32 %v656_v42, %v657_v54  ;;  %v573_v14 = vsel %vm306_vm3, %v1518_v51, -inf  ;;  %v570_v15 = vsel %vm306_vm3, %v1520_v52, -inf  ;;  %v469_v18 = vsel %vm324_vm8, %v1463_v44, -inf }
  0x99   : > { %451 = vmax.xlane.f32.xlu0 %v450_v24  ;;  %v689_v0 = vsel %vm288_vm15, %v679_v49, -inf  ;;  %v670_v55 = vmax.f32 %v668_v45, %v669_v50  ;;  %v705_v56 = vsel %vm306_vm3, %v679_v49, -inf  ;;  %v721_v57 = vsel %vm324_vm8, %v679_v49, -inf }
  0x9a   : > { %v1526_v58 = vsel %vm342_vm0, %v679_v49, -inf  ;;  %v683_v10 = vsel %vm288_vm15, %v665_v62, -inf  ;;  %v680_v11 = vsel %vm288_vm15, %v658_v2, -inf  ;;  %v699_v16 = vsel %vm306_vm3, %v665_v62, -inf }
  0x9b   : > { %v671_v59 = vrot.slane %v670_v55, 1  ;;  %v696_v17 = vsel %vm306_vm3, %v658_v2, -inf  ;;  %v466_v19 = vsel %vm324_vm8, %v1466_v48, -inf  ;;  %v583_v20 = vsel %vm324_vm8, %v1508_v37, -inf }
  0x9c   : > { %464 = vmax.xlane.f32.xlu1 %v463_v34  ;;  %v580_v21 = vsel %vm324_vm8, %v1510_v1, -inf  ;;  %v589_v22 = vsel %vm324_vm8, %v1518_v51, -inf  ;;  %v586_v5 = vsel %vm324_vm8, %v1520_v52, -inf  ;;  %v715_v44 = vsel %vm324_vm8, %v665_v62, -inf }
  0x9d   : > { %461 = vmax.xlane.f32.xlu0 %v460_v23  ;;  %v672_v3 = vmax.f32 %v670_v55, %v671_v59  ;;  %v712_v48 = vsel %vm324_vm8, %v658_v2, -inf  ;;  %v599_v24 = vsel %vm342_vm0, %v1508_v37, -inf  ;;  %v596_v25 = vsel %vm342_vm0, %v1510_v1, -inf }
  0x9e   : > { %v605_v26 = vsel %vm342_vm0, %v1518_v51, -inf  ;;  %v602_v27 = vsel %vm342_vm0, %v1520_v52, -inf  ;;  %v731_v28 = vsel %vm342_vm0, %v665_v62, -inf  ;;  %v728_v29 = vsel %vm342_vm0, %v658_v2, -inf }
  0x9f   : > { %v686_v6 = vsel %vm288_vm15, %v672_v3, -inf  ;;  %v702_v7 = vsel %vm306_vm3, %v672_v3, -inf  ;;  %v718_v8 = vsel %vm324_vm8, %v672_v3, -inf  ;;  %v734_v9 = vsel %vm342_vm0, %v672_v3, -inf }
  0xa0   : > { %552 = vmax.xlane.f32.xlu1 %v551_v46  ;;  %vm301_vm1 = vcmask 0   ;;  %vm319_vm15 = vcmask 8200   ;;  %vm337_vm3 = vcmask 16400   ;;  %vm355_vm8 = vcmask 24600  }
  0xa1   : > { %549 = vmax.xlane.f32.xlu0 %v548_v47 }
  0xa4   : > { %558 = vmax.xlane.f32.xlu1 %v557_v61 }
  0xa5   : > { %555 = vmax.xlane.f32.xlu0 %v554_v63 }
  0xa8   : > { %684 = vmax.xlane.f32.xlu1 %v683_v10 }
  0xa9   : > { %681 = vmax.xlane.f32.xlu0 %v680_v11 }
  0xac   : > { %690 = vmax.xlane.f32.xlu1 %v689_v0 }
  0xad   : > { %687 = vmax.xlane.f32.xlu0 %v686_v6 }
  0xb0   : > { %568 = vmax.xlane.f32.xlu1 %v567_v12 }
  0xb1   : > { %565 = vmax.xlane.f32.xlu0 %v564_v13 }
  0xb4   : > { %574 = vmax.xlane.f32.xlu1 %v573_v14 }
  0xb5   : > { %571 = vmax.xlane.f32.xlu0 %v570_v15 }
  0xb8   : > { %700 = vmax.xlane.f32.xlu1 %v699_v16 }
  0xb9   : > { %697 = vmax.xlane.f32.xlu0 %v696_v17 }
  0xbc   : > { %706 = vmax.xlane.f32.xlu1 %v705_v56 }
  0xbd   : > { %703 = vmax.xlane.f32.xlu0 %v702_v7 }
  0xc0   : > { %470 = vmax.xlane.f32.xlu1 %v469_v18 }
  0xc1   : > { %467 = vmax.xlane.f32.xlu0 %v466_v19 }
  0xc4   : > { %584 = vmax.xlane.f32.xlu1 %v583_v20 }
  0xc5   : > { %581 = vmax.xlane.f32.xlu0 %v580_v21 }
  0xc8   : > { %590 = vmax.xlane.f32.xlu1 %v589_v22 }
  0xc9   : > { %587 = vmax.xlane.f32.xlu0 %v586_v5 }
  0xcc   : > { %716 = vmax.xlane.f32.xlu1 %v715_v44 }
  0xcd   : > { %713 = vmax.xlane.f32.xlu0 %v712_v48 }
  0xd0   : > { %722 = vmax.xlane.f32.xlu1 %v721_v57 }
  0xd1   : > { %719 = vmax.xlane.f32.xlu0 %v718_v8 }
  0xd4   : > { %480 = vmax.xlane.f32.xlu1 %v1491_v4 }
  0xd5   : > { %477 = vmax.xlane.f32.xlu0 %v1495_v32 }
  0xd8   : > { %486 = vmax.xlane.f32.xlu1 %v1499_v33 }
  0xd9   : > { %483 = vmax.xlane.f32.xlu0 %v1506_v36 }
  0xdc   : > { %600 = vmax.xlane.f32.xlu1 %v599_v24 }
  0xdd   : > { %597 = vmax.xlane.f32.xlu0 %v596_v25 }
  0xe0   : > { %606 = vmax.xlane.f32.xlu1 %v605_v26 }
  0xe1   : > { %603 = vmax.xlane.f32.xlu0 %v602_v27 }
  0xe4   : > { %732 = vmax.xlane.f32.xlu1 %v731_v28 }
  0xe5   : > { %729 = vmax.xlane.f32.xlu0 %v728_v29 }
  0xe8   : > { %738 = vmax.xlane.f32.xlu1 %v1526_v58 }
  0xe9   : > { %735 = vmax.xlane.f32.xlu0 %v734_v9 }
  0xf9   : > { %v297_v4 = vpop.xlane.xlu1 %296 }
  0xfa   : > { %304 = vst.msk [vmem:[%s1579_s21 + $0x8] sm:$0x1] %vm301_vm1, %v297_v4  ;;  %v291_v30 = vpop.xlane.xlu0 %290 }
  0xfb   : > { %302 = vst.msk [vmem:[%s1579_s21] sm:$0x1] %vm301_vm1, %v291_v30 }
  0xfd   : > { %v300_v31 = vpop.xlane.xlu1 %299 }
  0xfe   : > { %305 = vst.msk [vmem:[%s1579_s21 + $0xc] sm:$0x1] %vm301_vm1, %v300_v31  ;;  %v294_v32 = vpop.xlane.xlu0 %293 }
  0xff   : > { %303 = vst.msk [vmem:[%s1579_s21 + $0x4] sm:$0x1] %vm301_vm1, %v294_v32 }
 0x101   : > { %v312_v33 = vpop.xlane.xlu1 %311 }
 0x102   : > { %321 = vst.msk [vmem:[%s1579_s21 + $0x4] sm:$0x1] %vm319_vm15, %v312_v33  ;;  %v309_v34 = vpop.xlane.xlu0 %308 }
 0x103   : > { %320 = vst.msk [vmem:[%s1579_s21] sm:$0x1] %vm319_vm15, %v309_v34 }
 0x105   : > { %v318_v35 = vpop.xlane.xlu1 %317 }
 0x106   : > { %323 = vst.msk [vmem:[%s1579_s21 + $0xc] sm:$0x1] %vm319_vm15, %v318_v35  ;;  %v315_v36 = vpop.xlane.xlu0 %314 }
 0x107   : > { %322 = vst.msk [vmem:[%s1579_s21 + $0x8] sm:$0x1] %vm319_vm15, %v315_v36 }
 0x109   : > { %v330_v37 = vpop.xlane.xlu1 %329 }
 0x10a   : > { %339 = vst.msk [vmem:[%s1579_s21 + $0x4] sm:$0x1] %vm337_vm3, %v330_v37  ;;  %v327_v1 = vpop.xlane.xlu0 %326 }
 0x10b   : > { %338 = vst.msk [vmem:[%s1579_s21] sm:$0x1] %vm337_vm3, %v327_v1 }
 0x10d   : > { %v336_v38 = vpop.xlane.xlu1 %335 }
 0x10e   : > { %341 = vst.msk [vmem:[%s1579_s21 + $0xc] sm:$0x1] %vm337_vm3, %v336_v38  ;;  %v333_v39 = vpop.xlane.xlu0 %332 }
 0x10f   : > { %340 = vst.msk [vmem:[%s1579_s21 + $0x8] sm:$0x1] %vm337_vm3, %v333_v39 }
 0x111   : > { %v348_v40 = vpop.xlane.xlu1 %347 }
 0x112   : > { %357 = vst.msk [vmem:[%s1579_s21 + $0x4] sm:$0x1] %vm355_vm8, %v348_v40  ;;  %v345_v60 = vpop.xlane.xlu0 %344 }
 0x113   : > { %356 = vst.msk [vmem:[%s1579_s21] sm:$0x1] %vm355_vm8, %v345_v60 }
 0x115   : > { %v354_v41 = vpop.xlane.xlu1 %353 }
 0x116   : > { %359 = vst.msk [vmem:[%s1579_s21 + $0xc] sm:$0x1] %vm355_vm8, %v354_v41  ;;  %v351_v42 = vpop.xlane.xlu0 %350 }
 0x117   : > { %358 = vst.msk [vmem:[%s1579_s21 + $0x8] sm:$0x1] %vm355_vm8, %v351_v42 }
 0x119   : > { %v433_v23 = vpop.xlane.xlu1 %432 }
 0x11a   : > { %441 = vst.msk [vmem:[%s1579_s21 + $0x5] sm:$0x1] %vm301_vm1, %v433_v23  ;;  %v430_v43 = vpop.xlane.xlu0 %429 }
 0x11b   : > { %440 = vst.msk [vmem:[%s1579_s21 + $0x1] sm:$0x1] %vm301_vm1, %v430_v43 }
 0x11d   : > { %v439_v45 = vpop.xlane.xlu1 %438 }
 0x11e   : > { %443 = vst.msk [vmem:[%s1579_s21 + $0xd] sm:$0x1] %vm301_vm1, %v439_v45  ;;  %v436_v46 = vpop.xlane.xlu0 %435 }
 0x11f   : > { %442 = vst.msk [vmem:[%s1579_s21 + $0x9] sm:$0x1] %vm301_vm1, %v436_v46 }
 0x121   : > { %v449_v47 = vpop.xlane.xlu1 %448 }
 0x122   : > { %457 = vst.msk [vmem:[%s1579_s21 + $0x5] sm:$0x1] %vm319_vm15, %v449_v47  ;;  %v446_v49 = vpop.xlane.xlu0 %445 }
 0x123   : > { %456 = vst.msk [vmem:[%s1579_s21 + $0x1] sm:$0x1] %vm319_vm15, %v446_v49 }
 0x125   : > { %v455_v50 = vpop.xlane.xlu1 %454 }
 0x126   : > { %459 = vst.msk [vmem:[%s1579_s21 + $0xd] sm:$0x1] %vm319_vm15, %v455_v50  ;;  %v452_v51 = vpop.xlane.xlu0 %451 }
 0x127   : > { %458 = vst.msk [vmem:[%s1579_s21 + $0x9] sm:$0x1] %vm319_vm15, %v452_v51 }
 0x129   : > { %v465_v52 = vpop.xlane.xlu1 %464 }
 0x12a   : > { %473 = vst.msk [vmem:[%s1579_s21 + $0x5] sm:$0x1] %vm337_vm3, %v465_v52  ;;  %v462_v53 = vpop.xlane.xlu0 %461 }
 0x12b   : > { %472 = vst.msk [vmem:[%s1579_s21 + $0x1] sm:$0x1] %vm337_vm3, %v462_v53 }
 0x12d   : > { %v553_v54 = vpop.xlane.xlu1 %552 }
 0x12e   : > { %561 = vst.msk [vmem:[%s1579_s21 + $0x6] sm:$0x1] %vm301_vm1, %v553_v54  ;;  %v550_v0 = vpop.xlane.xlu0 %549 }
 0x12f   : > { %560 = vst.msk [vmem:[%s1579_s21 + $0x2] sm:$0x1] %vm301_vm1, %v550_v0 }
 0x131   : > { %v559_v55 = vpop.xlane.xlu1 %558 }
 0x132   : > { %563 = vst.msk [vmem:[%s1579_s21 + $0xe] sm:$0x1] %vm301_vm1, %v559_v55  ;;  %v556_v56 = vpop.xlane.xlu0 %555 }
 0x133   : > { %562 = vst.msk [vmem:[%s1579_s21 + $0xa] sm:$0x1] %vm301_vm1, %v556_v56 }
 0x135   : > { %v685_v57 = vpop.xlane.xlu1 %684 }
 0x136   : > { %693 = vst.msk [vmem:[%s1579_s21 + $0x7] sm:$0x1] %vm301_vm1, %v685_v57  ;;  %v682_v58 = vpop.xlane.xlu0 %681 }
 0x137   : > { %692 = vst.msk [vmem:[%s1579_s21 + $0x3] sm:$0x1] %vm301_vm1, %v682_v58 }
 0x139   : > { %v691_v59 = vpop.xlane.xlu1 %690 }
 0x13a   : > { %695 = vst.msk [vmem:[%s1579_s21 + $0xf] sm:$0x1] %vm301_vm1, %v691_v59  ;;  %v688_v61 = vpop.xlane.xlu0 %687 }
 0x13b   : > { %694 = vst.msk [vmem:[%s1579_s21 + $0xb] sm:$0x1] %vm301_vm1, %v688_v61 }
 0x13d   : > { %v569_v62 = vpop.xlane.xlu1 %568 }
 0x13e   : > { %577 = vst.msk [vmem:[%s1579_s21 + $0x6] sm:$0x1] %vm319_vm15, %v569_v62  ;;  %v566_v63 = vpop.xlane.xlu0 %565 }
 0x13f   : > { %576 = vst.msk [vmem:[%s1579_s21 + $0x2] sm:$0x1] %vm319_vm15, %v566_v63 }
 0x141   : > { %v575_v2 = vpop.xlane.xlu1 %574 }
 0x142   : > { %579 = vst.msk [vmem:[%s1579_s21 + $0xe] sm:$0x1] %vm319_vm15, %v575_v2  ;;  %v572_v3 = vpop.xlane.xlu0 %571 }
 0x143   : > { %578 = vst.msk [vmem:[%s1579_s21 + $0xa] sm:$0x1] %vm319_vm15, %v572_v3 }
 0x145   : > { %v701_v6 = vpop.xlane.xlu1 %700 }
 0x146   : > { %709 = vst.msk [vmem:[%s1579_s21 + $0x7] sm:$0x1] %vm319_vm15, %v701_v6  ;;  %v698_v7 = vpop.xlane.xlu0 %697 }
 0x147   : > { %708 = vst.msk [vmem:[%s1579_s21 + $0x3] sm:$0x1] %vm319_vm15, %v698_v7 }
 0x149   : > { %v707_v8 = vpop.xlane.xlu1 %706 }
 0x14a   : > { %711 = vst.msk [vmem:[%s1579_s21 + $0xf] sm:$0x1] %vm319_vm15, %v707_v8  ;;  %v704_v9 = vpop.xlane.xlu0 %703 }
 0x14b   : > { %710 = vst.msk [vmem:[%s1579_s21 + $0xb] sm:$0x1] %vm319_vm15, %v704_v9 }
 0x14d   : > { %v471_v10 = vpop.xlane.xlu1 %470 }
 0x14e   : > { %475 = vst.msk [vmem:[%s1579_s21 + $0xd] sm:$0x1] %vm337_vm3, %v471_v10  ;;  %v468_v11 = vpop.xlane.xlu0 %467 }
 0x14f   : > { %474 = vst.msk [vmem:[%s1579_s21 + $0x9] sm:$0x1] %vm337_vm3, %v468_v11 }
 0x151   : > { %v585_v12 = vpop.xlane.xlu1 %584 }
 0x152   : > { %593 = vst.msk [vmem:[%s1579_s21 + $0x6] sm:$0x1] %vm337_vm3, %v585_v12  ;;  %v582_v13 = vpop.xlane.xlu0 %581 }
 0x153   : > { %592 = vst.msk [vmem:[%s1579_s21 + $0x2] sm:$0x1] %vm337_vm3, %v582_v13 }
 0x155   : > { %v591_v14 = vpop.xlane.xlu1 %590 }
 0x156   : > { %595 = vst.msk [vmem:[%s1579_s21 + $0xe] sm:$0x1] %vm337_vm3, %v591_v14  ;;  %v588_v15 = vpop.xlane.xlu0 %587 }
 0x157   : > { %594 = vst.msk [vmem:[%s1579_s21 + $0xa] sm:$0x1] %vm337_vm3, %v588_v15 }
 0x159   : > { %v717_v16 = vpop.xlane.xlu1 %716 }
 0x15a   : > { %725 = vst.msk [vmem:[%s1579_s21 + $0x7] sm:$0x1] %vm337_vm3, %v717_v16  ;;  %v714_v17 = vpop.xlane.xlu0 %713 }
 0x15b   : > { %724 = vst.msk [vmem:[%s1579_s21 + $0x3] sm:$0x1] %vm337_vm3, %v714_v17 }
 0x15d   : > { %v723_v18 = vpop.xlane.xlu1 %722 }
 0x15e   : > { %727 = vst.msk [vmem:[%s1579_s21 + $0xf] sm:$0x1] %vm337_vm3, %v723_v18  ;;  %v720_v19 = vpop.xlane.xlu0 %719 }
 0x15f   : > { %726 = vst.msk [vmem:[%s1579_s21 + $0xb] sm:$0x1] %vm337_vm3, %v720_v19 }
 0x161   : > { %v481_v20 = vpop.xlane.xlu1 %480 }
 0x162   : > { %489 = vst.msk [vmem:[%s1579_s21 + $0x5] sm:$0x1] %vm355_vm8, %v481_v20  ;;  %v478_v21 = vpop.xlane.xlu0 %477 }
 0x163   : > { %488 = vst.msk [vmem:[%s1579_s21 + $0x1] sm:$0x1] %vm355_vm8, %v478_v21 }
 0x165   : > { %v487_v22 = vpop.xlane.xlu1 %486 }
 0x166   : > { %491 = vst.msk [vmem:[%s1579_s21 + $0xd] sm:$0x1] %vm355_vm8, %v487_v22  ;;  %v484_v5 = vpop.xlane.xlu0 %483 }
 0x167   : > { %490 = vst.msk [vmem:[%s1579_s21 + $0x9] sm:$0x1] %vm355_vm8, %v484_v5 }
 0x169   : > { %v601_v44 = vpop.xlane.xlu1 %600 }
 0x16a   : > { %609 = vst.msk [vmem:[%s1579_s21 + $0x6] sm:$0x1] %vm355_vm8, %v601_v44  ;;  %v598_v48 = vpop.xlane.xlu0 %597 }
 0x16b   : > { %608 = vst.msk [vmem:[%s1579_s21 + $0x2] sm:$0x1] %vm355_vm8, %v598_v48 }
 0x16d   : > { %v607_v24 = vpop.xlane.xlu1 %606 }
 0x16e   : > { %611 = vst.msk [vmem:[%s1579_s21 + $0xe] sm:$0x1] %vm355_vm8, %v607_v24  ;;  %v604_v25 = vpop.xlane.xlu0 %603 }
 0x16f   : > { %610 = vst.msk [vmem:[%s1579_s21 + $0xa] sm:$0x1] %vm355_vm8, %v604_v25 }
 0x171   : > { %v733_v26 = vpop.xlane.xlu1 %732 }
 0x172   : > { %741 = vst.msk [vmem:[%s1579_s21 + $0x7] sm:$0x1] %vm355_vm8, %v733_v26  ;;  %v730_v27 = vpop.xlane.xlu0 %729 }
 0x173   : > { %740 = vst.msk [vmem:[%s1579_s21 + $0x3] sm:$0x1] %vm355_vm8, %v730_v27 }
 0x175   : > { %v739_v28 = vpop.xlane.xlu1 %738 }
 0x176   : > { %743 = vst.msk [vmem:[%s1579_s21 + $0xf] sm:$0x1] %vm355_vm8, %v739_v28  ;;  %v736_v29 = vpop.xlane.xlu0 %735 }
 0x177   : > { %742 = vst.msk [vmem:[%s1579_s21 + $0xb] sm:$0x1] %vm355_vm8, %v736_v29 }
 0x178   : > { %1042 = shalt.err (!%p1039_p9)
}
 0x179   : > { %s1043_s4 = scalar_lea.hbm %s1710_s7, 256  ;;  %s1047_s29 = scalar_lea.hbm %s1767_s2, 512 }
 0x17a   : > { %p1044_p1 = scmp.ne.s32.totalorder %s1710_s7, %s1043_s4  ;;  %p1048_p5 = scmp.lt.u32.totalorder %s1710_s7, %s1767_s2 }
 0x17b   : > { %p1049_p4 = scmp.lt.u32.totalorder %s1047_s29, %s1043_s4  ;;  %p1051_p0 = scmp.lt.u32.totalorder %s1043_s4, %s1710_s7 }
 0x17c   : > { %p1045_p6 = pnand %p1044_p1, %p1790_p3 }
 0x17d   : > { %p1050_p8 = por %p1049_p4, %p1048_p5 }
 0x17e   : > { %p1046_p2 = pneg %p1045_p6 }
 0x17f   : > { %p1052_p11 = por %p1051_p0, %p1050_p8 }
 0x181   : > { %p1053_p13 = pnand %p1052_p11, %p1046_p2 }
 0x183   : > { %1056 = shalt.err (!%p1053_p13)
}
 0x184   : > { %s1125_s15 = smov 64   ;;  %s1126_s21 = smov 4  }
 0x185   : > { %899 = dma.vmem_to_hbm [thread:$0]  (%p1790_p3), %s1712_s26, 256, %s1710_s7, %s745_s12, %s1125_s15, %s1125_s15, %s1126_s21  }
 0x186 PF: > { %s775_s19 = sand.u32 1, %s1095_s9   ;;  %p1791_p7 = scmp.ne.s32.totalorder %s1773_s24, 0 }
 0x187   : > { %p1792_p10 = scmp.ge.s32.totalorder %s1115_s14, 2  ;;  %s776_s30 = scalar_lea.sflag [#allocation4], %s775_s19 }
 0x189   : > { %p909_p12 = pnand %p1792_p10, %p1791_p7 }
 0x18b   : > { %1090 = dma.done.wait (!%p909_p12), %s776_s30, 256  }
 0x18c   : > { %1092 = vsyncadd (!%p909_p12), %s776_s30, 4294967040  ;;  %s21_s14 = sadd.s32 1, %s1115_s14   ;;  %s1793_s9 = smov %s1099_s10 }
 0x18d   : > { %p18_p9 = scmp.ge.s32.totalorder %s21_s14, 4   ;;  %s1794_s10 = smov %s1103_s11 }
 0x18e   : > { %s1795_s11 = smov %s1198_s23  ;;  %s1796_s12 = smov %s1111_s13 }
 0x18f   : > { %s1797_s13 = smov %s1799_s17  ;;  %20 = sbr.rel (!%p18_p9) target bundleno = 8 (0x8), region = 86 }
 0x196   :  { %781 = vsyncpa [#allocation3], 1 }
 0x197   :  { %783 = vsyncpa [#allocation3 + $0x1], 1 }
 0x198   :  { %784 = vsyncpa [#allocation6], 1 }
 0x199   :  { %786 = vsyncpa [#allocation6 + $0x1], 1 }
 0x19a   :  { %787 = vsyncpa [#allocation4], 1 }
 0x19b   :  { %789 = vsyncpa [#allocation4 + $0x1], 1 }

</bundles_post_ra>
